<compile_context>
chip_gen: v7x
topology: tpu7x:2x2x1
jax: 0.10.0
libtpu: 0.0.40
codegen_flags: <defaults>
</compile_context>

<pallas_src>
import jax
import jax.numpy as jnp
from jax import lax
from jax.experimental import pallas as pl
from jax.experimental.pallas import tpu as pltpu

LANE = 128
NEG_BIG = -1e9                        # additive mask bias for non-edges
VMEM_LIMIT_BYTES = 32 * 1024 * 1024   # explicit scoped VMEM (fits all of v5e/v6e/v7x)


def _round_up(x, m):
    return (x + m - 1) // m * m


def _pad2d(x, rows, cols):
    return jnp.pad(x, ((0, rows - x.shape[0]), (0, cols - x.shape[1])))


# ---------------------------------------------------------------------------
# Kernel 1: per-layer linear projection  Wh = h @ W   (bf16 MXU, f32 accum)
# ---------------------------------------------------------------------------
def _proj_kernel(h_ref, w_ref, wh_ref):
    wh_ref[...] = jnp.dot(
        h_ref[...].astype(jnp.bfloat16), w_ref[...],
        preferred_element_type=jnp.float32).astype(jnp.bfloat16)


def _project(h, w_bf16, *, tm):
    n, fin_p = h.shape
    fout_p = w_bf16.shape[1]
    return pl.pallas_call(
        _proj_kernel,
        out_shape=jax.ShapeDtypeStruct((n, fout_p), jnp.bfloat16),
        grid=(n // tm,),
        in_specs=[pl.BlockSpec((tm, fin_p), lambda i: (i, 0)),
                  pl.BlockSpec((fin_p, fout_p), lambda i: (0, 0))],   # W resident
        out_specs=pl.BlockSpec((tm, fout_p), lambda i: (i, 0)),
        compiler_params=pltpu.CompilerParams(
            dimension_semantics=("parallel",),
            vmem_limit_bytes=VMEM_LIMIT_BYTES),
    )(h, w_bf16)


# ---------------------------------------------------------------------------
# Kernel 2: GAT attention with flash-style online softmax over column blocks
# ---------------------------------------------------------------------------
def _gat_attn_kernel(whq_ref, whk_ref, bias_ref, a_ref, out_ref,
                     m_ref, l_ref, acc_ref):
    j = pl.program_id(1)

    @pl.when(j == 0)
    def _():
        m_ref[...] = jnp.full_like(m_ref, -jnp.inf)
        l_ref[...] = jnp.zeros_like(l_ref)
        acc_ref[...] = jnp.zeros_like(acc_ref)

    wh_q = whq_ref[...]                 # (TM, Fp) bf16
    wh_k = whk_ref[...]                 # (TN, Fp) bf16
    a = a_ref[...]                      # (2,  Fp) bf16  (row0=self, row1=neigh)

    # Attention projections on the MXU (keeps the XLU free for row reductions).
    attn_q = lax.dot_general(wh_q, a, (((1,), (1,)), ((), ())),
                             preferred_element_type=jnp.float32)      # (TM, 2)
    attn_k = lax.dot_general(a, wh_k, (((1,), (1,)), ((), ())),
                             preferred_element_type=jnp.float32)      # (2, TN)

    e = attn_q[:, 0:1] + attn_k[1:2, :]                  # (TM, TN) f32
    e = jnp.where(e > 0, e, 0.2 * e)                     # LeakyReLU(0.2)
    e = e + bias_ref[...].astype(jnp.float32)            # -1e9 on non-edges

    m_prev = m_ref[...]
    m_new = jnp.maximum(m_prev, jnp.max(e, axis=-1, keepdims=True))
    alpha = jnp.exp(m_prev - m_new)
    p = jnp.exp(e - m_new)
    l_ref[...] = alpha * l_ref[...] + jnp.sum(p, axis=-1, keepdims=True)
    acc_ref[...] = alpha * acc_ref[...] + jnp.dot(
        p.astype(jnp.bfloat16), wh_k, preferred_element_type=jnp.float32)
    m_ref[...] = m_new

    @pl.when(j == pl.num_programs(1) - 1)
    def _():
        # Exact reciprocal (only O(TM) work here) so rows sum to 1 like F.softmax.
        h_prime = acc_ref[...] * pl.reciprocal(l_ref[...], approx=False)
        # ELU; exp only on the clamped-negative part.
        out_ref[...] = jnp.where(h_prime > 0, h_prime,
                                 jnp.exp(jnp.minimum(h_prime, 0.0)) - 1.0)


def _gat_attention(wh, bias, a_bf16, *, tm, tn):
    n, fp = wh.shape
    return pl.pallas_call(
        _gat_attn_kernel,
        out_shape=jax.ShapeDtypeStruct((n, fp), jnp.float32),
        grid=(n // tm, n // tn),                       # reduction (column) axis last
        in_specs=[
            pl.BlockSpec((tm, fp), lambda i, j: (i, 0)),   # query rows (resident over j)
            pl.BlockSpec((tn, fp), lambda i, j: (j, 0)),   # key/value rows
            pl.BlockSpec((tm, tn), lambda i, j: (i, j)),   # bf16 adj bias: the big HBM
                                                           # stream, default depth-2 DMA
            pl.BlockSpec((2, fp), lambda i, j: (0, 0)),    # attention vectors (resident)
        ],
        out_specs=pl.BlockSpec((tm, fp), lambda i, j: (i, 0)),
        scratch_shapes=[pltpu.VMEM((tm, 1), jnp.float32),   # running max
                        pltpu.VMEM((tm, 1), jnp.float32),   # running sum
                        pltpu.VMEM((tm, fp), jnp.float32)],  # PV accumulator
        compiler_params=pltpu.CompilerParams(
            dimension_semantics=("parallel", "arbitrary"),
            vmem_limit_bytes=VMEM_LIMIT_BYTES),
    )(wh, wh, bias, a_bf16)


# ---------------------------------------------------------------------------
# Kernel 3: row-wise L2 normalisation (bottleneck embedding z)
# ---------------------------------------------------------------------------
def _l2norm_kernel(h_ref, z_ref):
    h = h_ref[...]
    sq = jnp.sum(h * h, axis=-1, keepdims=True)
    # torch.nn.functional.normalize(p=2, dim=1): h / max(||h||, 1e-12)
    z_ref[...] = h * lax.rsqrt(jnp.maximum(sq, 1e-24))


def _l2_normalize(h, *, tm):
    n, fp = h.shape
    return pl.pallas_call(
        _l2norm_kernel,
        out_shape=jax.ShapeDtypeStruct((n, fp), jnp.float32),
        grid=(n // tm,),
        in_specs=[pl.BlockSpec((tm, fp), lambda i: (i, 0))],
        out_specs=pl.BlockSpec((tm, fp), lambda i: (i, 0)),
        compiler_params=pltpu.CompilerParams(
            dimension_semantics=("parallel",),
            vmem_limit_bytes=VMEM_LIMIT_BYTES),
    )(h)


# ---------------------------------------------------------------------------
# Full DHGC forward
# ---------------------------------------------------------------------------
@jax.jit
def dhgc_forward(params, x, adj):
    encoder = list(params["encoder"])
    decoder = list(params["decoder"])
    layers = encoder + decoder
    num_enc = len(encoder)

    n, dim_in = x.shape
    z_dim = encoder[-1]["w"].shape[1]

    # Row / column tile sizes.
    # TODO(synk): for N not a multiple of 128, pad the node axis (masked rows)
    # instead of falling back to a single block.
    tm = LANE if n % LANE == 0 else n
    tn = LANE if n % LANE == 0 else n

    # Additive mask bias: computed ONCE, shipped in bf16 (halves the only
    # O(N^2) HBM stream), reused by every layer as a single VPU add.
    bias = jnp.where(adj > 0, 0.0, NEG_BIG).astype(jnp.bfloat16)

    # Lane-dense feature layout: pad feature dims to 128 (free on the MXU,
    # removes masked partial stores); slice back at the end.
    fin_p = _round_up(dim_in, LANE)
    h = _pad2d(x.astype(jnp.float32), n, fin_p)

    z_pad = None
    for idx, layer in enumerate(layers):
        w, a = layer["w"], layer["a"]
        fout_p = _round_up(w.shape[1], LANE)
        w_pad = _pad2d(w, fin_p, fout_p).astype(jnp.bfloat16)
        a_pad = _pad2d(a, 2, fout_p).astype(jnp.bfloat16)

        wh = _project(h, w_pad, tm=tm)                       # (N, Fp) bf16
        h = _gat_attention(wh, bias, a_pad, tm=tm, tn=tn)    # (N, Fp) f32

        if idx == num_enc - 1:
            # z = normalize(encoder output); the decoder keeps consuming the
            # UN-normalised h, exactly as in the PyTorch AE_GAT/DHGC reference.
            z_pad = _l2_normalize(h, tm=tm)

        fin_p = fout_p

    return z_pad[:, :z_dim], h[:, :dim_in]


# ---------------------------------------------------------------------------
# Parameters (pretrained state-dict loading replaced by xavier init)
# ---------------------------------------------------------------------------
def init_gat_params(key, f_in, f_out):
    k_w, k_a = jax.random.split(key)
    lim = float(jnp.sqrt(6.0 / (f_in + f_out)))
    w = jax.random.uniform(k_w, (f_in, f_out), jnp.float32, -lim, lim)
    lim_a = float(jnp.sqrt(6.0 / (f_out + 1)))
    a = jax.random.uniform(k_a, (2, f_out), jnp.float32, -lim_a, lim_a)
    return {"w": w, "a": a}     # row0 = a_self, row1 = a_neigh


def init_dhgc_params(key, dim_input, dims_encoder, dims_decoder):
    dims_en = [dim_input] + list(dims_encoder)
    dims_de = list(dims_decoder) + [dim_input]
    num_layer = len(dims_en) - 1
    keys = jax.random.split(key, 2 * num_layer)
    enc = [init_gat_params(keys[i], dims_en[i], dims_en[i + 1])
           for i in range(num_layer)]
    dec = [init_gat_params(keys[num_layer + i], dims_de[i], dims_de[i + 1])
           for i in range(num_layer)]
    return {"encoder": enc, "decoder": dec}


# ---------------------------------------------------------------------------
# Pure-jnp reference (same bf16 MXU operand quantisation as the kernels)
# ---------------------------------------------------------------------------
def reference_forward(params, x, adj):
    bf16 = jnp.bfloat16
    layers = list(params["encoder"]) + list(params["decoder"])
    num_enc = len(params["encoder"])
    mask = adj > 0
    h, z = x, None
    for idx, layer in enumerate(layers):
        w = layer["w"].astype(bf16)
        a = layer["a"].astype(bf16)
        wh = jnp.dot(h.astype(bf16), w, preferred_element_type=jnp.float32).astype(bf16)
        attn_self = jnp.dot(wh, a[0:1, :].T, preferred_element_type=jnp.float32)
        attn_neigh = jnp.dot(wh, a[1:2, :].T, preferred_element_type=jnp.float32)
        e = attn_self + attn_neigh.T
        e = jnp.where(e > 0, e, 0.2 * e)
        e = jnp.where(mask, e, NEG_BIG)
        e = e - jnp.max(e, axis=1, keepdims=True)
        p = jnp.exp(e)
        l = jnp.sum(p, axis=1, keepdims=True)
        h = jnp.dot(p.astype(bf16), wh, preferred_element_type=jnp.float32) / l
        h = jnp.where(h > 0, h, jnp.exp(jnp.minimum(h, 0.0)) - 1.0)
        if idx == num_enc - 1:
            nrm = jnp.sqrt(jnp.sum(h * h, axis=1, keepdims=True))
            z = h / jnp.maximum(nrm, 1e-12)
    return z, h


# ---------------------------------------------------------------------------
# main
# ---------------------------------------------------------------------------
if __name__ == "__main__":
    key = jax.random.PRNGKey(0)
    k_x, k_adj, k_params = jax.random.split(key, 3)

    # Small shapes, but N is a multiple of 128 so the (row, col) attention grid
    # is actually exercised (2x2 grid with 128x128 tiles).
    n_nodes = 256
    dim_input = 32
    dims_encoder = [16, 8]
    dims_decoder = [8, 16]          # decoder: 8 -> 16 -> 32 (= dim_input)

    x = jax.random.normal(k_x, (n_nodes, dim_input), jnp.float32)

    # Symmetric binary adjacency with self-loops (every row has >= 1 edge).
    edges = (jax.random.uniform(k_adj, (n_nodes, n_nodes)) < 0.05).astype(jnp.float32)
    adj = jnp.clip(edges + edges.T + jnp.eye(n_nodes, dtype=jnp.float32), 0.0, 1.0)

    params = init_dhgc_params(k_params, dim_input, dims_encoder, dims_decoder)

    z, x_hat = dhgc_forward(params, x, adj)
    jax.block_until_ready((z, x_hat))

    assert z.shape == (n_nodes, dims_encoder[-1])
    assert x_hat.shape == (n_nodes, dim_input)
    assert bool(jnp.all(jnp.isfinite(z))) and bool(jnp.all(jnp.isfinite(x_hat)))

    # Correctness vs. a pure-jnp reference with matching bf16 quantisation.
    z_ref, x_ref = reference_forward(params, x, adj)
    err_z = float(jnp.max(jnp.abs(z - z_ref)))
    err_x = float(jnp.max(jnp.abs(x_hat - x_ref)))
    assert err_z < 5e-2 and err_x < 5e-2, (err_z, err_x)

    # TODO(synk): DHGC.prediction (vMF mixture responsibilities) is not part of
    # forward(); it is plain matmul/exp glue and is omitted here.
    print("KERNEL_OK")
</pallas_src>

<mosaic_0001>
module attributes {stable_mosaic.version = 11 : i64} {
  func.func @_proj_kernel(%arg0: i32, %arg1: memref<128x128xf32, #tpu.memory_space<vmem>>, %arg2: memref<128x128xbf16, #tpu.memory_space<vmem>>, %arg3: memref<128x128xbf16, #tpu.memory_space<vmem>>) attributes {dimension_semantics = [#tpu.dimension_semantics<parallel>], iteration_bounds = array<i64: 2>, scalar_prefetch = 0 : i64, scratch_operands = 0 : i64, tpu.core_type = #tpu.core_type<tc>, window_params = [{transform_indices = @transform_0, window_bounds = array<i64: 128, 128>}, {pipeline_mode = #tpu.pipeline_mode<synchronous>, transform_indices = @transform_1, window_bounds = array<i64: 128, 128>}, {transform_indices = @transform_2, window_bounds = array<i64: 128, 128>}]} {
    %c0 = arith.constant 0 : index
    %c0_0 = arith.constant 0 : index
    %0 = vector.load %arg1[%c0, %c0_0] : memref<128x128xf32, #tpu.memory_space<vmem>>, vector<128x128xf32>
    %1 = arith.truncf %0 : vector<128x128xf32> to vector<128x128xbf16>
    %c0_1 = arith.constant 0 : index
    %c0_2 = arith.constant 0 : index
    %2 = vector.load %arg2[%c0_1, %c0_2] : memref<128x128xbf16, #tpu.memory_space<vmem>>, vector<128x128xbf16>
    %cst = arith.constant dense<0.000000e+00> : vector<128x128xf32>
    %3 = tpu.matmul %1, %2, %cst {dimension_numbers = #tpu.dot_dimension_numbers<[1], [0], [0], [1], [0, 0, 1, 1], [], []>} : vector<128x128xbf16>, vector<128x128xbf16>, vector<128x128xf32> -> vector<128x128xf32>
    %4 = arith.truncf %3 : vector<128x128xf32> to vector<128x128xbf16>
    %c0_3 = arith.constant 0 : index
    %c0_4 = arith.constant 0 : index
    %5 = vector.load %arg3[%c0_3, %c0_4] : memref<128x128xbf16, #tpu.memory_space<vmem>>, vector<128x128xbf16>
    tpu.vector_store %arg3[%c0_3, %c0_4], %4 {strides = array<i32>} : memref<128x128xbf16, #tpu.memory_space<vmem>>, vector<128x128xbf16>,
    return
  }
  func.func @transform_0(%arg0: i32) -> (i32, i32) {
    %c0_i32 = arith.constant 0 : i32
    %c0_i32_0 = arith.constant 0 : i32
    return %arg0, %c0_i32 : i32, i32
  }
  func.func @transform_1(%arg0: i32) -> (i32, i32) {
    %c0_i32 = arith.constant 0 : i32
    %c0_i32_0 = arith.constant 0 : i32
    %c0_i32_1 = arith.constant 0 : i32
    return %c0_i32, %c0_i32_0 : i32, i32
  }
  func.func @transform_2(%arg0: i32) -> (i32, i32) {
    %c0_i32 = arith.constant 0 : i32
    %c0_i32_0 = arith.constant 0 : i32
    return %arg0, %c0_i32 : i32, i32
  }
}

module attributes {stable_mosaic.version = 11 : i64} {
  func.func @_gat_attn_kernel(%arg0: i32, %arg1: i32, %arg2: memref<128x128xbf16, #tpu.memory_space<vmem>>, %arg3: memref<128x128xbf16, #tpu.memory_space<vmem>>, %arg4: memref<128x128xbf16, #tpu.memory_space<vmem>>, %arg5: memref<2x128xbf16, #tpu.memory_space<vmem>>, %arg6: memref<128x128xf32, #tpu.memory_space<vmem>>, %arg7: memref<128x1xf32, #tpu.memory_space<vmem>>, %arg8: memref<128x1xf32, #tpu.memory_space<vmem>>, %arg9: memref<128x128xf32, #tpu.memory_space<vmem>>) attributes {dimension_semantics = [#tpu.dimension_semantics<parallel>, #tpu.dimension_semantics<arbitrary>], iteration_bounds = array<i64: 2, 2>, scalar_prefetch = 0 : i64, scratch_operands = 3 : i64, tpu.core_type = #tpu.core_type<tc>, window_params = [{transform_indices = @transform_0, window_bounds = array<i64: 128, 128>}, {transform_indices = @transform_1, window_bounds = array<i64: 128, 128>}, {transform_indices = @transform_2, window_bounds = array<i64: 128, 128>}, {pipeline_mode = #tpu.pipeline_mode<synchronous>, transform_indices = @transform_3, window_bounds = array<i64: 2, 128>}, {transform_indices = @transform_4, window_bounds = array<i64: 128, 128>}]} {
    %c0_i32 = arith.constant 0 : i32
    %0 = arith.cmpi eq, %arg1, %c0_i32 : i32
    %1 = arith.extui %0 : i1 to i32
    %c0_i32_0 = arith.constant 0 : i32
    %2 = arith.cmpi ne, %1, %c0_i32_0 : i32
    scf.if %2 {
      %cst_27 = arith.constant 0xFF800000 : f32
      %47 = vector.broadcast %cst_27 : f32 to vector<128x1xf32>
      %c0_28 = arith.constant 0 : index
      %c0_29 = arith.constant 0 : index
      %48 = vector.load %arg7[%c0_28, %c0_29] : memref<128x1xf32, #tpu.memory_space<vmem>>, vector<128x1xf32>
      tpu.vector_store %arg7[%c0_28, %c0_29], %47 {strides = array<i32>} : memref<128x1xf32, #tpu.memory_space<vmem>>, vector<128x1xf32>,
      %cst_30 = arith.constant 0.000000e+00 : f32
      %49 = vector.broadcast %cst_30 : f32 to vector<128x1xf32>
      %c0_31 = arith.constant 0 : index
      %c0_32 = arith.constant 0 : index
      %50 = vector.load %arg8[%c0_31, %c0_32] : memref<128x1xf32, #tpu.memory_space<vmem>>, vector<128x1xf32>
      tpu.vector_store %arg8[%c0_31, %c0_32], %49 {strides = array<i32>} : memref<128x1xf32, #tpu.memory_space<vmem>>, vector<128x1xf32>,
      %cst_33 = arith.constant 0.000000e+00 : f32
      %51 = vector.broadcast %cst_33 : f32 to vector<128x128xf32>
      %c0_34 = arith.constant 0 : index
      %c0_35 = arith.constant 0 : index
      %52 = vector.load %arg9[%c0_34, %c0_35] : memref<128x128xf32, #tpu.memory_space<vmem>>, vector<128x128xf32>
      tpu.vector_store %arg9[%c0_34, %c0_35], %51 {strides = array<i32>} : memref<128x128xf32, #tpu.memory_space<vmem>>, vector<128x128xf32>,
    } else {
    }
    %c0 = arith.constant 0 : index
    %c0_1 = arith.constant 0 : index
    %3 = vector.load %arg2[%c0, %c0_1] : memref<128x128xbf16, #tpu.memory_space<vmem>>, vector<128x128xbf16>
    %c0_2 = arith.constant 0 : index
    %c0_3 = arith.constant 0 : index
    %4 = vector.load %arg3[%c0_2, %c0_3] : memref<128x128xbf16, #tpu.memory_space<vmem>>, vector<128x128xbf16>
    %c0_4 = arith.constant 0 : index
    %c0_5 = arith.constant 0 : index
    %5 = vector.load %arg5[%c0_4, %c0_5] : memref<2x128xbf16, #tpu.memory_space<vmem>>, vector<2x128xbf16>
    %cst = arith.constant dense<0.000000e+00> : vector<128x2xf32>
    %6 = tpu.matmul %3, %5, %cst {dimension_numbers = #tpu.dot_dimension_numbers<[1], [1], [0], [0], [0, 0, 1, 0], [], []>} : vector<128x128xbf16>, vector<2x128xbf16>, vector<128x2xf32> -> vector<128x2xf32>
    %cst_6 = arith.constant dense<0.000000e+00> : vector<2x128xf32>
    %7 = tpu.matmul %5, %4, %cst_6 {dimension_numbers = #tpu.dot_dimension_numbers<[1], [1], [0], [0], [0, 0, 1, 0], [], []>} : vector<2x128xbf16>, vector<128x128xbf16>, vector<2x128xf32> -> vector<2x128xf32>
    %8 = vector.extract_strided_slice %6 {offsets = [0, 0], sizes = [128, 1], strides = [1, 1]} : vector<128x2xf32> to vector<128x1xf32>
    %9 = vector.extract_strided_slice %7 {offsets = [1, 0], sizes = [1, 128], strides = [1, 1]} : vector<2x128xf32> to vector<1x128xf32>
    %10 = vector.broadcast %8 : vector<128x1xf32> to vector<128x128xf32>
    %11 = vector.broadcast %9 : vector<1x128xf32> to vector<128x128xf32>
    %12 = arith.addf %10, %11 : vector<128x128xf32>
    %cst_7 = arith.constant 0.000000e+00 : f32
    %13 = vector.broadcast %cst_7 : f32 to vector<128x128xf32>
    %14 = arith.cmpf ogt, %12, %13 : vector<128x128xf32>
    %cst_8 = arith.constant 2.000000e-01 : f32
    %15 = vector.broadcast %cst_8 : f32 to vector<128x128xf32>
    %16 = arith.mulf %15, %12 : vector<128x128xf32>
    %17 = arith.select %14, %12, %16 : vector<128x128xi1>, vector<128x128xf32>
    %c0_9 = arith.constant 0 : index
    %c0_10 = arith.constant 0 : index
    %18 = vector.load %arg4[%c0_9, %c0_10] : memref<128x128xbf16, #tpu.memory_space<vmem>>, vector<128x128xbf16>
    %19 = arith.extf %18 : vector<128x128xbf16> to vector<128x128xf32>
    %20 = arith.addf %17, %19 : vector<128x128xf32>
    %c0_11 = arith.constant 0 : index
    %c0_12 = arith.constant 0 : index
    %21 = vector.load %arg7[%c0_11, %c0_12] : memref<128x1xf32, #tpu.memory_space<vmem>>, vector<128x1xf32>
    %cst_13 = arith.constant dense<0xFF800000> : vector<128xf32>
    %22 = vector.multi_reduction <maximumf>, %20, %cst_13 [1] : vector<128x128xf32> to vector<128xf32>
    %23 = vector.shape_cast %22 : vector<128xf32> to vector<128x1xf32>
    %24 = arith.maximumf %21, %23 : vector<128x1xf32>
    %25 = arith.subf %21, %24 : vector<128x1xf32>
    %26 = math.exp %25 : vector<128x1xf32>
    %27 = vector.broadcast %24 : vector<128x1xf32> to vector<128x128xf32>
    %28 = arith.subf %20, %27 : vector<128x128xf32>
    %29 = math.exp %28 : vector<128x128xf32>
    %c0_14 = arith.constant 0 : index
    %c0_15 = arith.constant 0 : index
    %30 = vector.load %arg8[%c0_14, %c0_15] : memref<128x1xf32, #tpu.memory_space<vmem>>, vector<128x1xf32>
    %31 = arith.mulf %26, %30 : vector<128x1xf32>
    %cst_16 = arith.constant dense<0.000000e+00> : vector<128xf32>
    %32 = vector.multi_reduction <add>, %29, %cst_16 [1] : vector<128x128xf32> to vector<128xf32>
    %33 = vector.shape_cast %32 : vector<128xf32> to vector<128x1xf32>
    %34 = arith.addf %31, %33 : vector<128x1xf32>
    %c0_17 = arith.constant 0 : index
    %c0_18 = arith.constant 0 : index
    %35 = vector.load %arg8[%c0_17, %c0_18] : memref<128x1xf32, #tpu.memory_space<vmem>>, vector<128x1xf32>
    tpu.vector_store %arg8[%c0_17, %c0_18], %34 {strides = array<i32>} : memref<128x1xf32, #tpu.memory_space<vmem>>, vector<128x1xf32>,
    %c0_19 = arith.constant 0 : index
    %c0_20 = arith.constant 0 : index
    %36 = vector.load %arg9[%c0_19, %c0_20] : memref<128x128xf32, #tpu.memory_space<vmem>>, vector<128x128xf32>
    %37 = vector.broadcast %26 : vector<128x1xf32> to vector<128x128xf32>
    %38 = arith.mulf %37, %36 : vector<128x128xf32>
    %39 = arith.truncf %29 : vector<128x128xf32> to vector<128x128xbf16>
    %cst_21 = arith.constant dense<0.000000e+00> : vector<128x128xf32>
    %40 = tpu.matmul %39, %4, %cst_21 {dimension_numbers = #tpu.dot_dimension_numbers<[1], [0], [0], [1], [0, 0, 1, 1], [], []>} : vector<128x128xbf16>, vector<128x128xbf16>, vector<128x128xf32> -> vector<128x128xf32>
    %41 = arith.addf %38, %40 : vector<128x128xf32>
    %c0_22 = arith.constant 0 : index
    %c0_23 = arith.constant 0 : index
    %42 = vector.load %arg9[%c0_22, %c0_23] : memref<128x128xf32, #tpu.memory_space<vmem>>, vector<128x128xf32>
    tpu.vector_store %arg9[%c0_22, %c0_23], %41 {strides = array<i32>} : memref<128x128xf32, #tpu.memory_space<vmem>>, vector<128x128xf32>,
    %c0_24 = arith.constant 0 : index
    %c0_25 = arith.constant 0 : index
    %43 = vector.load %arg7[%c0_24, %c0_25] : memref<128x1xf32, #tpu.memory_space<vmem>>, vector<128x1xf32>
    tpu.vector_store %arg7[%c0_24, %c0_25], %24 {strides = array<i32>} : memref<128x1xf32, #tpu.memory_space<vmem>>, vector<128x1xf32>,
    %c1_i32 = arith.constant 1 : i32
    %44 = arith.cmpi eq, %arg1, %c1_i32 : i32
    %45 = arith.extui %44 : i1 to i32
    %c0_i32_26 = arith.constant 0 : i32
    %46 = arith.cmpi ne, %45, %c0_i32_26 : i32
    scf.if %46 {
      %c0_27 = arith.constant 0 : index
      %c0_28 = arith.constant 0 : index
      %47 = vector.load %arg9[%c0_27, %c0_28] : memref<128x128xf32, #tpu.memory_space<vmem>>, vector<128x128xf32>
      %c0_29 = arith.constant 0 : index
      %c0_30 = arith.constant 0 : index
      %48 = vector.load %arg8[%c0_29, %c0_30] : memref<128x1xf32, #tpu.memory_space<vmem>>, vector<128x1xf32>
      %49 = tpu.reciprocal %48 : vector<128x1xf32> -> vector<128x1xf32>
      %50 = vector.broadcast %49 : vector<128x1xf32> to vector<128x128xf32>
      %51 = arith.mulf %47, %50 : vector<128x128xf32>
      %cst_31 = arith.constant 0.000000e+00 : f32
      %52 = vector.broadcast %cst_31 : f32 to vector<128x128xf32>
      %53 = arith.cmpf ogt, %51, %52 : vector<128x128xf32>
      %cst_32 = arith.constant 0.000000e+00 : f32
      %54 = vector.broadcast %cst_32 : f32 to vector<128x128xf32>
      %55 = arith.minimumf %51, %54 : vector<128x128xf32>
      %56 = math.exp %55 : vector<128x128xf32>
      %cst_33 = arith.constant 1.000000e+00 : f32
      %57 = vector.broadcast %cst_33 : f32 to vector<128x128xf32>
      %58 = arith.subf %56, %57 : vector<128x128xf32>
      %59 = arith.select %53, %51, %58 : vector<128x128xi1>, vector<128x128xf32>
      %c0_34 = arith.constant 0 : index
      %c0_35 = arith.constant 0 : index
      %60 = vector.load %arg6[%c0_34, %c0_35] : memref<128x128xf32, #tpu.memory_space<vmem>>, vector<128x128xf32>
      tpu.vector_store %arg6[%c0_34, %c0_35], %59 {strides = array<i32>} : memref<128x128xf32, #tpu.memory_space<vmem>>, vector<128x128xf32>,
    } else {
    }
    return
  }
  func.func @transform_0(%arg0: i32, %arg1: i32) -> (i32, i32) {
    %c0_i32 = arith.constant 0 : i32
    %c0_i32_0 = arith.constant 0 : i32
    return %arg0, %c0_i32 : i32, i32
  }
  func.func @transform_1(%arg0: i32, %arg1: i32) -> (i32, i32) {
    %c0_i32 = arith.constant 0 : i32
    %c0_i32_0 = arith.constant 0 : i32
    return %arg1, %c0_i32 : i32, i32
  }
  func.func @transform_2(%arg0: i32, %arg1: i32) -> (i32, i32) {
    %c0_i32 = arith.constant 0 : i32
    return %arg0, %arg1 : i32, i32
  }
  func.func @transform_3(%arg0: i32, %arg1: i32) -> (i32, i32) {
    %c0_i32 = arith.constant 0 : i32
    %c0_i32_0 = arith.constant 0 : i32
    %c0_i32_1 = arith.constant 0 : i32
    return %c0_i32, %c0_i32_0 : i32, i32
  }
  func.func @transform_4(%arg0: i32, %arg1: i32) -> (i32, i32) {
    %c0_i32 = arith.constant 0 : i32
    %c0_i32_0 = arith.constant 0 : i32
    return %arg0, %c0_i32 : i32, i32
  }
}

module attributes {stable_mosaic.version = 11 : i64} {
  func.func @_l2norm_kernel(%arg0: i32, %arg1: memref<128x128xf32, #tpu.memory_space<vmem>>, %arg2: memref<128x128xf32, #tpu.memory_space<vmem>>) attributes {dimension_semantics = [#tpu.dimension_semantics<parallel>], iteration_bounds = array<i64: 2>, scalar_prefetch = 0 : i64, scratch_operands = 0 : i64, tpu.core_type = #tpu.core_type<tc>, window_params = [{transform_indices = @transform_0, window_bounds = array<i64: 128, 128>}, {transform_indices = @transform_1, window_bounds = array<i64: 128, 128>}]} {
    %c0 = arith.constant 0 : index
    %c0_0 = arith.constant 0 : index
    %0 = vector.load %arg1[%c0, %c0_0] : memref<128x128xf32, #tpu.memory_space<vmem>>, vector<128x128xf32>
    %1 = arith.mulf %0, %0 : vector<128x128xf32>
    %cst = arith.constant dense<0.000000e+00> : vector<128xf32>
    %2 = vector.multi_reduction <add>, %1, %cst [1] : vector<128x128xf32> to vector<128xf32>
    %3 = vector.shape_cast %2 : vector<128xf32> to vector<128x1xf32>
    %cst_1 = arith.constant 1.000000e-24 : f32
    %4 = vector.broadcast %cst_1 : f32 to vector<128x1xf32>
    %5 = arith.maximumf %3, %4 : vector<128x1xf32>
    %6 = math.rsqrt %5 : vector<128x1xf32>
    %7 = vector.broadcast %6 : vector<128x1xf32> to vector<128x128xf32>
    %8 = arith.mulf %0, %7 : vector<128x128xf32>
    %c0_2 = arith.constant 0 : index
    %c0_3 = arith.constant 0 : index
    %9 = vector.load %arg2[%c0_2, %c0_3] : memref<128x128xf32, #tpu.memory_space<vmem>>, vector<128x128xf32>
    tpu.vector_store %arg2[%c0_2, %c0_3], %8 {strides = array<i32>} : memref<128x128xf32, #tpu.memory_space<vmem>>, vector<128x128xf32>,
    return
  }
  func.func @transform_0(%arg0: i32) -> (i32, i32) {
    %c0_i32 = arith.constant 0 : i32
    %c0_i32_0 = arith.constant 0 : i32
    return %arg0, %c0_i32 : i32, i32
  }
  func.func @transform_1(%arg0: i32) -> (i32, i32) {
    %c0_i32 = arith.constant 0 : i32
    %c0_i32_0 = arith.constant 0 : i32
    return %arg0, %c0_i32 : i32, i32
  }
}

</mosaic_0001>

<bundles_post_ra>
// kernel: dhgc_forward.13
= control target key start
LH: loop header
LB: loop body
LE: loop exit
PB: predicated region body
PF: predicated region fallthrough
CT: control target
= control target key end

     0   :  { %s373_s6 = smov 0   ;;  %s513_s0 = inlined_call_operand.vmem [shape: f32[256,128], index: 0, kind: input, shape index: {}]   ;;  %s514_s1 = inlined_call_operand.vmem [shape: f32[256,128], index: 1, kind: output, shape index: {}]  }
   0x1 LB: > { %s304_s7 = sadd.s32 4294967295, %s361_s6   ;;  %p308_p0 = scmp.ge.s32.totalorder %s361_s6, 1  ;;  %s361_s6 = sphi %s373_s6, %s11_s6  }
   0x2   : > { %p88_p1 = scmp.lt.s32.totalorder %s361_s6, 3 }
   0x4   : > { %p89_p2 = pnand %p308_p0, %p88_p1 }
   0x5   : > { %s309_s8 = sshll.u32 (!%p89_p2), %s304_s7, 4 }
   0x6   : > { %92 = sbr.rel (%p89_p2) target bundleno = 206 (0xce), region = 24  ;;  %p109_p3 = scmp.lt.s32.totalorder (!%p89_p2), %s309_s8, 31 }
   0xd   : > { %s516_s8 = smov (!%p109_p3, %s309_s8), 31 }
   0xe   : > { %s310_s9 = sshll.u32 %s516_s8, 3 }
   0xf   : > { %s389_s12 = scalar_lea.vmem %s513_s0, %s310_s9  ;;  %s476_s15 = scalar_lea.vmem %s514_s1, %s310_s9 }
  0x10   : > { %v392_v0 = vld [vmem:[%s389_s12 + $0x10] sm:$0xff]  ;;  %v395_v1 = vld [vmem:[%s389_s12] sm:$0xff]  ;;  %v398_v2 = vld [vmem:[%s389_s12 + $0x18] sm:$0xff] }
  0x11   : > { %v138_v3 = vmul.f32 %v392_v0, %v392_v0  ;;  %v136_v4 = vmul.f32 %v395_v1, %v395_v1  ;;  %v405_v5 = vld [vmem:[%s389_s12 + $0x8] sm:$0xff]  ;;  %v139_v6 = vmul.f32 %v398_v2, %v398_v2  ;;  %v415_v9 = vld [vmem:[%s389_s12 + $0x20] sm:$0xff]  ;;  %v422_v12 = vld [vmem:[%s389_s12 + $0x38] sm:$0xff] }
  0x12   : > { %v137_v7 = vmul.f32 %v405_v5, %v405_v5  ;;  %v412_v8 = vld [vmem:[%s389_s12 + $0x28] sm:$0xff]  ;;  %v140_v11 = vmul.f32 %v415_v9, %v415_v9  ;;  %v425_v13 = vld [vmem:[%s389_s12 + $0x30] sm:$0xff]  ;;  %v143_v14 = vmul.f32 %v422_v12, %v422_v12  ;;  %v435_v17 = vld [vmem:[%s389_s12 + $0x40] sm:$0xff] }
  0x13   : > { %156 = vadd.xlane.f32.xlu1 %v138_v3  ;;  %152 = vadd.xlane.f32.xlu0 %v136_v4  ;;  %v141_v10 = vmul.f32 %v412_v8, %v412_v8  ;;  %v142_v15 = vmul.f32 %v425_v13, %v425_v13  ;;  %v432_v16 = vld [vmem:[%s389_s12 + $0x48] sm:$0xff]  ;;  %v144_v19 = vmul.f32 %v435_v17, %v435_v17  ;;  %v442_v20 = vld [vmem:[%s389_s12 + $0x58] sm:$0xff]  ;;  %v445_v21 = vld [vmem:[%s389_s12 + $0x50] sm:$0xff] }
  0x14   : > { %v145_v18 = vmul.f32 %v432_v16, %v432_v16  ;;  %v147_v22 = vmul.f32 %v442_v20, %v442_v20  ;;  %v146_v23 = vmul.f32 %v445_v21, %v445_v21  ;;  %v452_v24 = vld [vmem:[%s389_s12 + $0x68] sm:$0xff]  ;;  %v455_v25 = vld [vmem:[%s389_s12 + $0x60] sm:$0xff]  ;;  %v462_v28 = vld [vmem:[%s389_s12 + $0x78] sm:$0xff] }
  0x15   : > { %v149_v26 = vmul.f32 %v452_v24, %v452_v24  ;;  %v148_v27 = vmul.f32 %v455_v25, %v455_v25  ;;  %v465_v29 = vld [vmem:[%s389_s12 + $0x70] sm:$0xff]  ;;  %v151_v30 = vmul.f32 %v462_v28, %v462_v28 }
  0x16   : > { %v150_v31 = vmul.f32 %v465_v29, %v465_v29 }
  0x17   : > { %158 = vadd.xlane.f32.xlu1 %v139_v6  ;;  %154 = vadd.xlane.f32.xlu0 %v137_v7 }
  0x1b   : > { %162 = vadd.xlane.f32.xlu1 %v141_v10  ;;  %160 = vadd.xlane.f32.xlu0 %v140_v11 }
  0x1f   : > { %166 = vadd.xlane.f32.xlu1 %v143_v14  ;;  %164 = vadd.xlane.f32.xlu0 %v142_v15 }
  0x23   : > { %170 = vadd.xlane.f32.xlu1 %v145_v18  ;;  %168 = vadd.xlane.f32.xlu0 %v144_v19 }
  0x27   : > { %174 = vadd.xlane.f32.xlu1 %v147_v22  ;;  %172 = vadd.xlane.f32.xlu0 %v146_v23 }
  0x2b   : > { %178 = vadd.xlane.f32.xlu1 %v149_v26  ;;  %176 = vadd.xlane.f32.xlu0 %v148_v27 }
  0x2f   : > { %182 = vadd.xlane.f32.xlu1 %v151_v30  ;;  %180 = vadd.xlane.f32.xlu0 %v150_v31 }
  0xa0   : > { %v157_v32 = vpop.xlane.xlu1 %156  ;;  %v153_v33 = vpop.xlane.xlu0 %152 }
  0xa1   : > { %v186_v34 = vmax.f32 %v157_v32, 1e-24  ;;  %v184_v35 = vmax.f32 %v153_v33, 1e-24 }
  0xa3   : > { %323 = vrsqrt.f32 %v186_v34 }
  0xa4   : > { %325 = vrsqrt.f32 %v184_v35  ;;  %v159_v36 = vpop.xlane.xlu1 %158  ;;  %v155_v37 = vpop.xlane.xlu0 %154 }
  0xa5   : > { %v187_v38 = vmax.f32 %v159_v36, 1e-24  ;;  %v185_v39 = vmax.f32 %v155_v37, 1e-24 }
  0xa7   : > { %327 = vrsqrt.f32 %v187_v38 }
  0xa8   : > { %329 = vrsqrt.f32 %v185_v39  ;;  %v163_v40 = vpop.xlane.xlu1 %162  ;;  %v161_v41 = vpop.xlane.xlu0 %160 }
  0xa9   : > { %v189_v42 = vmax.f32 %v163_v40, 1e-24  ;;  %v188_v43 = vmax.f32 %v161_v41, 1e-24 }
  0xab   : > { %331 = vrsqrt.f32 %v189_v42 }
  0xac   : > { %333 = vrsqrt.f32 %v188_v43  ;;  %v167_v44 = vpop.xlane.xlu1 %166  ;;  %v165_v45 = vpop.xlane.xlu0 %164 }
  0xad   : > { %v324_v46 = vpop.eup %323  ;;  %v191_v47 = vmax.f32 %v167_v44, 1e-24  ;;  %v190_v48 = vmax.f32 %v165_v45, 1e-24 }
  0xae   : > { %v326_v49 = vpop.eup %325  ;;  %v218_v50 = vmul.f32 %v324_v46, %v392_v0 }
  0xaf   : > { %v216_v51 = vmul.f32 %v326_v49, %v395_v1  ;;  %335 = vrsqrt.f32 %v191_v47 }
  0xb0   : > { %234 = vst [vmem:[%s476_s15 + $0x10] sm:$0xff] %v218_v50  ;;  %337 = vrsqrt.f32 %v190_v48  ;;  %v171_v52 = vpop.xlane.xlu1 %170  ;;  %v169_v53 = vpop.xlane.xlu0 %168 }
  0xb1   : > { %v328_v54 = vpop.eup %327  ;;  %232 = vst [vmem:[%s476_s15] sm:$0xff] %v216_v51  ;;  %v193_v55 = vmax.f32 %v171_v52, 1e-24  ;;  %v192_v56 = vmax.f32 %v169_v53, 1e-24 }
  0xb2   : > { %v330_v57 = vpop.eup %329  ;;  %v219_v58 = vmul.f32 %v328_v54, %v398_v2 }
  0xb3   : > { %v217_v59 = vmul.f32 %v330_v57, %v405_v5  ;;  %339 = vrsqrt.f32 %v193_v55 }
  0xb4   : > { %235 = vst [vmem:[%s476_s15 + $0x18] sm:$0xff] %v219_v58  ;;  %341 = vrsqrt.f32 %v192_v56  ;;  %v175_v60 = vpop.xlane.xlu1 %174  ;;  %v173_v61 = vpop.xlane.xlu0 %172 }
  0xb5   : > { %v332_v62 = vpop.eup %331  ;;  %233 = vst [vmem:[%s476_s15 + $0x8] sm:$0xff] %v217_v59  ;;  %v195_v63 = vmax.f32 %v175_v60, 1e-24  ;;  %v194_v0 = vmax.f32 %v173_v61, 1e-24 }
  0xb6   : > { %v334_v1 = vpop.eup %333  ;;  %v221_v3 = vmul.f32 %v332_v62, %v412_v8 }
  0xb7   : > { %v220_v4 = vmul.f32 %v334_v1, %v415_v9  ;;  %343 = vrsqrt.f32 %v195_v63 }
  0xb8   : > { %237 = vst [vmem:[%s476_s15 + $0x28] sm:$0xff] %v221_v3  ;;  %345 = vrsqrt.f32 %v194_v0  ;;  %v179_v2 = vpop.xlane.xlu1 %178  ;;  %v177_v5 = vpop.xlane.xlu0 %176 }
  0xb9   : > { %v336_v6 = vpop.eup %335  ;;  %236 = vst [vmem:[%s476_s15 + $0x20] sm:$0xff] %v220_v4  ;;  %v197_v7 = vmax.f32 %v179_v2, 1e-24  ;;  %v196_v10 = vmax.f32 %v177_v5, 1e-24 }
  0xba   : > { %v338_v11 = vpop.eup %337  ;;  %v223_v14 = vmul.f32 %v336_v6, %v422_v12 }
  0xbb   : > { %v222_v15 = vmul.f32 %v338_v11, %v425_v13  ;;  %347 = vrsqrt.f32 %v197_v7 }
  0xbc   : > { %239 = vst [vmem:[%s476_s15 + $0x38] sm:$0xff] %v223_v14  ;;  %349 = vrsqrt.f32 %v196_v10  ;;  %v183_v8 = vpop.xlane.xlu1 %182  ;;  %v181_v9 = vpop.xlane.xlu0 %180 }
  0xbd   : > { %v340_v18 = vpop.eup %339  ;;  %238 = vst [vmem:[%s476_s15 + $0x30] sm:$0xff] %v222_v15  ;;  %v199_v19 = vmax.f32 %v183_v8, 1e-24  ;;  %v198_v22 = vmax.f32 %v181_v9, 1e-24 }
  0xbe   : > { %v342_v23 = vpop.eup %341  ;;  %v225_v26 = vmul.f32 %v340_v18, %v432_v16 }
  0xbf   : > { %v224_v12 = vmul.f32 %v342_v23, %v435_v17  ;;  %351 = vrsqrt.f32 %v199_v19 }
  0xc0   : > { %241 = vst [vmem:[%s476_s15 + $0x48] sm:$0xff] %v225_v26  ;;  %353 = vrsqrt.f32 %v198_v22 }
  0xc1   : > { %v344_v13 = vpop.eup %343  ;;  %240 = vst [vmem:[%s476_s15 + $0x40] sm:$0xff] %v224_v12 }
  0xc2   : > { %v346_v27 = vpop.eup %345  ;;  %v227_v30 = vmul.f32 %v344_v13, %v442_v20 }
  0xc3   : > { %v226_v31 = vmul.f32 %v346_v27, %v445_v21 }
  0xc4   : > { %243 = vst [vmem:[%s476_s15 + $0x58] sm:$0xff] %v227_v30 }
  0xc5   : > { %v348_v32 = vpop.eup %347  ;;  %242 = vst [vmem:[%s476_s15 + $0x50] sm:$0xff] %v226_v31 }
  0xc6   : > { %v350_v16 = vpop.eup %349  ;;  %v229_v33 = vmul.f32 %v348_v32, %v452_v24 }
  0xc7   : > { %v228_v17 = vmul.f32 %v350_v16, %v455_v25 }
  0xc8   : > { %245 = vst [vmem:[%s476_s15 + $0x68] sm:$0xff] %v229_v33 }
  0xc9   : > { %v352_v34 = vpop.eup %351  ;;  %244 = vst [vmem:[%s476_s15 + $0x60] sm:$0xff] %v228_v17 }
  0xca   : > { %v354_v35 = vpop.eup %353  ;;  %v231_v36 = vmul.f32 %v352_v34, %v462_v28 }
  0xcb   : > { %v230_v37 = vmul.f32 %v354_v35, %v465_v29 }
  0xcc   : > { %247 = vst [vmem:[%s476_s15 + $0x78] sm:$0xff] %v231_v36 }
  0xcd   : > { %246 = vst [vmem:[%s476_s15 + $0x70] sm:$0xff] %v230_v37 }
  0xce PF: > { %s11_s6 = sadd.s32 1, %s361_s6  }
  0xcf   : > { %p8_p4 = scmp.ge.s32.totalorder %s11_s6, 4  }
  0xd1   :  { %10 = sbr.rel (!%p8_p4) target bundleno = 1 (0x1), region = 54 }

// kernel: dhgc_forward.9
= control target key start
LH: loop header
LB: loop body
LE: loop exit
PB: predicated region body
PF: predicated region fallthrough
CT: control target
= control target key end

     0   :  { %s670_s9 = smov 0   ;;  %s733_s0 = inlined_call_operand.vmem [shape: f32[256,128], index: 0, kind: input, shape index: {}]   ;;  %s734_s1 = inlined_call_operand.vmem [shape: bf16[128,128], index: 1, kind: input, shape index: {}]   ;;  %s735_s2 = inlined_call_operand.vmem [shape: bf16[256,128], index: 2, kind: output, shape index: {}]  }
   0x1 LB: > { %s469_s10 = sadd.s32 4294967295, %s653_s9   ;;  %p473_p0 = scmp.ge.s32.totalorder %s653_s9, 1  ;;  %s653_s9 = sphi %s670_s9, %s12_s9  }
   0x2   : > { %p113_p1 = scmp.lt.s32.totalorder %s653_s9, 3 }
   0x4   : > { %p114_p2 = pnand %p473_p0, %p113_p1 }
   0x5   : > { %v639_v0 = vld [vmem:[%s734_s1] sm:$0xff] (!%p114_p2)   ;;  %s474_s13 = sshll.u32 (!%p114_p2), %s469_s10, 4  ;;  %v640_v1 = vld [vmem:[%s734_s1 + $0x8] sm:$0xff] (!%p114_p2)   ;;  %v641_v2 = vld [vmem:[%s734_s1 + $0x10] sm:$0xff] (!%p114_p2)  }
   0x6   : > { %117 = sbr.rel (%p114_p2) target bundleno = 265 (0x109), region = 28  ;;  %p136_p3 = scmp.lt.s32.totalorder (!%p114_p2), %s474_s13, 31  ;;  %583 = vmatprep.subr.bf16.mxu0 (!%p114_p2), %v639_v0  ;;  %615 = vmatprep.subr.bf16.mxu1 (!%p114_p2), %v639_v0  ;;  %v642_v3 = vld [vmem:[%s734_s1 + $0x18] sm:$0xff] (!%p114_p2)   ;;  %v643_v10 = vld [vmem:[%s734_s1 + $0x20] sm:$0xff] (!%p114_p2)   ;;  %v644_v11 = vld [vmem:[%s734_s1 + $0x28] sm:$0xff] (!%p114_p2)  }
   0x7   : > { %584 = vmatpush3.bf16.msra.mxu0 (!%p114_p2), %v639_v0  ;;  %623 = vmatpush3.bf16.msra.mxu1 (!%p114_p2), %v639_v0  ;;  %v645_v12 = vld [vmem:[%s734_s1 + $0x30] sm:$0xff] (!%p114_p2)   ;;  %v646_v13 = vld [vmem:[%s734_s1 + $0x38] sm:$0xff] (!%p114_p2)  }
   0x8   : > { %585 = vmatprep.subr.bf16.mxu0 (!%p114_p2), %v640_v1  ;;  %616 = vmatprep.subr.bf16.mxu1 (!%p114_p2), %v640_v1 }
   0xb   : > { %586 = vmatpush3.bf16.msra.mxu0 (!%p114_p2), %v640_v1  ;;  %624 = vmatpush3.bf16.msra.mxu1 (!%p114_p2), %v640_v1 }
   0xc   : > { %587 = vmatprep.subr.bf16.mxu0 (!%p114_p2), %v641_v2  ;;  %617 = vmatprep.subr.bf16.mxu1 (!%p114_p2), %v641_v2 }
   0xd   : > { %s737_s13 = smov (!%p136_p3, %s474_s13), 31 }
   0xe   : > { %s475_s18 = sshll.u32 %s737_s13, 3  ;;  %s477_s4 = sshll.u32 %s737_s13, 2 }
   0xf   : > { %s693_s21 = scalar_lea.vmem %s733_s0, %s475_s18  ;;  %588 = vmatpush3.bf16.msra.mxu0 %v641_v2  ;;  %625 = vmatpush3.bf16.msra.mxu1 %v641_v2  ;;  %s145_s7 = scalar_lea.vmem %s735_s2, %s477_s4 }
  0x10   : > { %v148_v4 = vld [vmem:[%s693_s21] sm:$0xff]  ;;  %v149_v5 = vld [vmem:[%s693_s21 + $0x8] sm:$0xff]  ;;  %589 = vmatprep.subr.bf16.mxu0 %v642_v3  ;;  %618 = vmatprep.subr.bf16.mxu1 %v642_v3  ;;  %v150_v14 = vld [vmem:[%s693_s21 + $0x10] sm:$0xff] }
  0x11   : > { %v156_v6 = vld [vmem:[%s693_s21 + $0x40] sm:$0xff]  ;;  %v164_v7 = vpack.c.bf16 %v149_v5, %v148_v4  ;;  %v157_v8 = vld [vmem:[%s693_s21 + $0x48] sm:$0xff]  ;;  %v151_v15 = vld [vmem:[%s693_s21 + $0x18] sm:$0xff] }
  0x12   : > { %v168_v9 = vpack.c.bf16 %v157_v8, %v156_v6  ;;  %v158_v16 = vld [vmem:[%s693_s21 + $0x50] sm:$0xff]  ;;  %v159_v17 = vld [vmem:[%s693_s21 + $0x58] sm:$0xff]  ;;  %v152_v18 = vld [vmem:[%s693_s21 + $0x20] sm:$0xff]  ;;  %v165_v22 = vpack.c.bf16 %v151_v15, %v150_v14 }
  0x13   : > { %599 = vmatprep.mubr.bf16.mxu0 %v164_v7  ;;  %590 = vmatpush3.bf16.msra.mxu0 %v642_v3  ;;  %v153_v19 = vld [vmem:[%s693_s21 + $0x28] sm:$0xff]  ;;  %v160_v20 = vld [vmem:[%s693_s21 + $0x60] sm:$0xff]  ;;  %v169_v23 = vpack.c.bf16 %v159_v17, %v158_v16  ;;  %v154_v26 = vld [vmem:[%s693_s21 + $0x30] sm:$0xff] }
  0x14   : > { %607 = vmatprep.mubr.bf16.mxu1 %v168_v9  ;;  %626 = vmatpush3.bf16.msra.mxu1 %v642_v3  ;;  %v161_v21 = vld [vmem:[%s693_s21 + $0x68] sm:$0xff]  ;;  %v166_v24 = vpack.c.bf16 %v153_v19, %v152_v18  ;;  %v155_v27 = vld [vmem:[%s693_s21 + $0x38] sm:$0xff]  ;;  %v162_v28 = vld [vmem:[%s693_s21 + $0x70] sm:$0xff] }
  0x15   : > { %591 = vmatprep.subr.bf16.mxu0 %v643_v10  ;;  %619 = vmatprep.subr.bf16.mxu1 %v643_v10  ;;  %v170_v25 = vpack.c.bf16 %v161_v21, %v160_v20  ;;  %v163_v29 = vld [vmem:[%s693_s21 + $0x78] sm:$0xff]  ;;  %v167_v30 = vpack.c.bf16 %v155_v27, %v154_v26 }
  0x16   : > { %v171_v31 = vpack.c.bf16 %v163_v29, %v162_v28 }
  0x17   : > { %592 = vmatpush3.bf16.msra.mxu0 %v643_v10 }
  0x18   : > { %627 = vmatpush3.bf16.msra.mxu1 %v643_v10  ;;  %593 = vmatprep.subr.bf16.mxu0 %v644_v11 }
  0x19   : > { %620 = vmatprep.subr.bf16.mxu1 %v644_v11 }
  0x1b   : > { %594 = vmatpush3.bf16.msra.mxu0 %v644_v11 }
  0x1c   : > { %628 = vmatpush3.bf16.msra.mxu1 %v644_v11  ;;  %595 = vmatprep.subr.bf16.mxu0 %v645_v12 }
  0x1d   : > { %621 = vmatprep.subr.bf16.mxu1 %v645_v12 }
  0x1f   : > { %596 = vmatpush3.bf16.msra.mxu0 %v645_v12 }
  0x20   : > { %629 = vmatpush3.bf16.msra.mxu1 %v645_v12  ;;  %597 = vmatprep.subr.bf16.mxu0 %v646_v13 }
  0x21   : > { %622 = vmatprep.subr.bf16.mxu1 %v646_v13 }
  0x23   : > { %598 = vmatpush3.bf16.msra.mxu0 %v646_v13 }
  0x24   : > { %630 = vmatpush3.bf16.msra.mxu1 %v646_v13 }
  0x26   : > { %600 = vmatmul.mubr.bf16.vlgmr.msra.gmra.mrb[0].mxu0 %v165_v22 }
  0x27   : > { %608 = vmatmul.mubr.bf16.vlgmr.msra.gmra.mrb[0].mxu1 %v169_v23  ;;  %603 = vmatprep.mubr.bf16.mxu0 %v166_v24 }
  0x28   : > { %611 = vmatprep.mubr.bf16.mxu1 %v170_v25 }
  0x2e   : > { %604 = vmatmul.mubr.bf16.gmra.mrb[4].mxu0 %v167_v30 }
  0x2f   : > { %612 = vmatmul.mubr.bf16.gmra.mrb[4].mxu1 %v171_v31 }
  0xf9   : > { %v601_v32 = vpop.f32.mrb[0].mxu0 }
  0xfa   : > { %v609_v33 = vpop.f32.mrb[0].mxu1  ;;  %v270_v34 = vpop.f32.mrb[1].mxu0 }
  0xfb   : > { %v302_v35 = vpop.f32.mrb[1].mxu1  ;;  %v602_v36 = vpop.f32.mrb[2].mxu0 }
  0xfc   : > { %v610_v37 = vpop.f32.mrb[2].mxu1  ;;  %v528_v38 = vpack.c.bf16 %v602_v36, %v601_v32  ;;  %v273_v40 = vpop.f32.mrb[3].mxu0 }
  0xfd   : > { %v548_v39 = vpack.c.bf16 %v610_v37, %v609_v33  ;;  %v305_v41 = vpop.f32.mrb[3].mxu1  ;;  %v523_v42 = vpack.c.bf16 %v273_v40, %v270_v34 }
  0xfe   : > { %v543_v43 = vpack.c.bf16 %v305_v41, %v302_v35  ;;  %560 = vst [vmem:[%s145_s7 + $0x8] sm:$0xff] %v528_v38  }
  0xff   : > { %564 = vst [vmem:[%s145_s7 + $0x28] sm:$0xff] %v548_v39   ;;  %524 = vst [vmem:[%s145_s7] sm:$0xff] %v523_v42  }
 0x100   : > { %563 = vst [vmem:[%s145_s7 + $0x20] sm:$0xff] %v543_v43  }
 0x101   : > { %v605_v44 = vpop.f32.mrb[4].mxu0 }
 0x102   : > { %v613_v45 = vpop.f32.mrb[4].mxu1  ;;  %v286_v46 = vpop.f32.mrb[5].mxu0 }
 0x103   : > { %v318_v47 = vpop.f32.mrb[5].mxu1  ;;  %v606_v48 = vpop.f32.mrb[6].mxu0 }
 0x104   : > { %v614_v49 = vpop.f32.mrb[6].mxu1  ;;  %v538_v50 = vpack.c.bf16 %v606_v48, %v605_v44  ;;  %v289_v52 = vpop.f32.mrb[7].mxu0 }
 0x105   : > { %v558_v51 = vpack.c.bf16 %v614_v49, %v613_v45  ;;  %v321_v53 = vpop.f32.mrb[7].mxu1  ;;  %v533_v54 = vpack.c.bf16 %v289_v52, %v286_v46 }
 0x106   : > { %v553_v55 = vpack.c.bf16 %v321_v53, %v318_v47  ;;  %562 = vst [vmem:[%s145_s7 + $0x18] sm:$0xff] %v538_v50  }
 0x107   : > { %566 = vst [vmem:[%s145_s7 + $0x38] sm:$0xff] %v558_v51   ;;  %561 = vst [vmem:[%s145_s7 + $0x10] sm:$0xff] %v533_v54  }
 0x108   : > { %565 = vst [vmem:[%s145_s7 + $0x30] sm:$0xff] %v553_v55  }
 0x109 PF: > { %s12_s9 = sadd.s32 1, %s653_s9  }
 0x10a   : > { %p9_p4 = scmp.ge.s32.totalorder %s12_s9, 4  }
 0x10c   :  { %11 = sbr.rel (!%p9_p4) target bundleno = 1 (0x1), region = 58 }

// kernel: dhgc_forward.10
= control target key start
LH: loop header
LB: loop body
LE: loop exit
PB: predicated region body
PF: predicated region fallthrough
CT: control target
= control target key end

     0   :  { %s2333_s15 = smov 0   ;;  %s2335_s16 = smov 0   ;;  %s2911_s0 = inlined_call_operand.vmem [shape: bf16[256,128], index: 0, kind: input, shape index: {}, may-alias: {0,1}]   ;;  %s2912_s1 = inlined_call_operand.vmem [shape: bf16[256,128], index: 1, kind: input, shape index: {}, may-alias: {0,1}]   ;;  %s2913_s2 = inlined_call_operand.vmem [shape: bf16[256,256], index: 2, kind: input, shape index: {}]   ;;  %s2914_s3 = inlined_call_operand.vmem [shape: bf16[2,128], index: 3, kind: input, shape index: {}]   ;;  %s2915_s4 = inlined_call_operand.vmem [shape: f32[256,128], index: 4, kind: output, shape index: {}]  }
   0x1   :  { %s2337_s17 = smov 0   ;;  %s2339_s18 = smov 0  }
   0x2   :  { %s2341_s19 = smov 0   ;;  %s2343_s20 = smov 0  }
   0x3   :  { %s2345_s21 = smov 0  }
   0x4 LB: > { %s23_s22 = sadd.s32 1, %s2292_s19  ;;  %s26_s23 = sadd.s32 1, %s2296_s20  ;;  %s2300_s21 = sphi %s2345_s21, %s14_s21   ;;  %s2296_s20 = sphi %s2343_s20, %s2921_s20   ;;  %s2292_s19 = sphi %s2341_s19, %s2920_s19   ;;  %s2288_s18 = sphi %s2339_s18, %s2919_s18   ;;  %s2284_s17 = sphi %s2337_s17, %s2918_s17   ;;  %s2280_s16 = sphi %s2335_s16, %s2917_s16   ;;  %s2276_s15 = sphi %s2333_s15, %s2916_s15  }
   0x5   : > { %p24_p0 = scmp.ge.s32.totalorder %s23_s22, 2  ;;  %p94_p1 = scmp.ne.s32.totalorder %s2280_s16, %s2276_s15 }
   0x6   : > { %p95_p2 = scmp.eq.s32.totalorder %s2300_s21, 0  ;;  %s87_s27 = sadd.s32 1, %s2280_s16 }
   0x7   : > { %s2923_s22 = smov (%p24_p0, %s23_s22), 0  ;;  %s2925_s23 = smov (!%p24_p0, %s26_s23), %s2296_s20 }
   0x8   : > { %p96_p3 = por %p95_p2, %p94_p1  ;;  %p28_p4 = scmp.ge.s32.totalorder %s2925_s23, 2 }
   0x9   : > { %s83_s24 = ssub.s32 %s2292_s19, %s2923_s22  ;;  %p1843_p6 = scmp.ge.s32.totalorder %s2300_s21, 4 }
   0xa   : > { %s2927_s23 = smov (%p28_p4, %s2925_s23), 0 }
   0xb   : > { %s82_s25 = ssub.s32 %s2296_s20, %s2927_s23  ;;  %170 = sbr.rel (%p1843_p6) target bundleno = 34 (0x22), region = 20 }
   0xc   : > { %s84_s26 = sor.u32 %s83_s24, %s82_s25 }
   0xd   : > { %p85_p5 = scmp.eq.s32.totalorder %s84_s26, 0 }
   0xf   : > { %s2384_s28 = scalar_select %p85_p5, %s2280_s16, %s87_s27  }
  0x12   : > { %191 = sbr.rel (!%p96_p3) target bundleno = 34 (0x22), region = 32  ;;  %s193_s29 = sand.u32 (%p96_p3), 1, %s2280_s16  }
  0x13   : > { %s1892_s30 = sshll.u32 (%p96_p3), %s2296_s20, 5  ;;  %s1844_s5 = sshll.u32 (%p96_p3), %s193_s29, 6 }
  0x14   : > { %s198_s6 = sadd.s32 (%p96_p3), %s2292_s19, %s1892_s30  ;;  %s195_s11 = scalar_lea.vmem (%p96_p3), [#allocation5], %s1844_s5 }
  0x15   : > { %s1847_s7 = sshll.u32 (%p96_p3), %s198_s6, 2 }
  0x16   : > { %s2393_s10 = scalar_lea.vmem (%p96_p3), %s2913_s2, %s1847_s7 }
  0x17   : > { %v216_v0 = vld [vmem:[%s2393_s10] sm:$0xf] (%p96_p3)  ;;  %v218_v1 = vld [vmem:[%s2393_s10 + $0x8] sm:$0xf] (%p96_p3)  ;;  %v220_v2 = vld [vmem:[%s2393_s10 + $0x10] sm:$0xf] (%p96_p3) }
  0x18   : > { %217 = vst [vmem:[%s195_s11] sm:$0xf] (%p96_p3), %v216_v0  ;;  %219 = vst [vmem:[%s195_s11 + $0x4] sm:$0xf] (%p96_p3), %v218_v1  ;;  %v222_v3 = vld [vmem:[%s2393_s10 + $0x18] sm:$0xf] (%p96_p3) }
  0x19   : > { %221 = vst [vmem:[%s195_s11 + $0x8] sm:$0xf] %v220_v2  ;;  %v224_v4 = vld [vmem:[%s2393_s10 + $0x20] sm:$0xf]  ;;  %v226_v5 = vld [vmem:[%s2393_s10 + $0x28] sm:$0xf] }
  0x1a   : > { %223 = vst [vmem:[%s195_s11 + $0xc] sm:$0xf] %v222_v3  ;;  %225 = vst [vmem:[%s195_s11 + $0x10] sm:$0xf] %v224_v4  ;;  %v228_v6 = vld [vmem:[%s2393_s10 + $0x30] sm:$0xf] }
  0x1b   : > { %227 = vst [vmem:[%s195_s11 + $0x14] sm:$0xf] %v226_v5  ;;  %v230_v7 = vld [vmem:[%s2393_s10 + $0x38] sm:$0xf]  ;;  %v232_v8 = vld [vmem:[%s2393_s10 + $0x40] sm:$0xf] }
  0x1c   : > { %229 = vst [vmem:[%s195_s11 + $0x18] sm:$0xf] %v228_v6  ;;  %231 = vst [vmem:[%s195_s11 + $0x1c] sm:$0xf] %v230_v7  ;;  %v234_v9 = vld [vmem:[%s2393_s10 + $0x48] sm:$0xf] }
  0x1d   : > { %233 = vst [vmem:[%s195_s11 + $0x20] sm:$0xf] %v232_v8  ;;  %v236_v10 = vld [vmem:[%s2393_s10 + $0x50] sm:$0xf]  ;;  %v238_v11 = vld [vmem:[%s2393_s10 + $0x58] sm:$0xf] }
  0x1e   : > { %235 = vst [vmem:[%s195_s11 + $0x24] sm:$0xf] %v234_v9  ;;  %237 = vst [vmem:[%s195_s11 + $0x28] sm:$0xf] %v236_v10  ;;  %v240_v12 = vld [vmem:[%s2393_s10 + $0x60] sm:$0xf] }
  0x1f   : > { %239 = vst [vmem:[%s195_s11 + $0x2c] sm:$0xf] %v238_v11  ;;  %v242_v13 = vld [vmem:[%s2393_s10 + $0x68] sm:$0xf]  ;;  %v244_v14 = vld [vmem:[%s2393_s10 + $0x70] sm:$0xf] }
  0x20   : > { %241 = vst [vmem:[%s195_s11 + $0x30] sm:$0xf] %v240_v12  ;;  %243 = vst [vmem:[%s195_s11 + $0x34] sm:$0xf] %v242_v13  ;;  %v246_v15 = vld [vmem:[%s2393_s10 + $0x78] sm:$0xf] }
  0x21   : > { %245 = vst [vmem:[%s195_s11 + $0x38] sm:$0xf] %v244_v14  ;;  %247 = vst [vmem:[%s195_s11 + $0x3c] sm:$0xf] %v246_v15 }
  0x22 PF: > { %p1848_p7 = scmp.ge.s32.totalorder %s2300_s21, 1  ;;  %p301_p8 = scmp.lt.s32.totalorder %s2300_s21, 5 }
  0x24   : > { %p302_p9 = pnand %p1848_p7, %p301_p8 }
  0x25   : > { %s308_s12 = sand.u32 (!%p302_p9), 1, %s2276_s15   ;;  %s1850_s13 = sshll.u32 (!%p302_p9), %s2288_s18, 4 }
  0x26   : > { %305 = sbr.rel (%p302_p9) target bundleno = 1127 (0x467), region = 73  ;;  %s1849_s14 = sshll.u32 (!%p302_p9), %s308_s12, 6 }
  0x27   : > { %p344_p10 = scmp.lt.s32.totalorder (!%p302_p9), %s1850_s13, 31  ;;  %s1852_s24 = sshll.u32 (!%p302_p9), %s2284_s17, 4 }
  0x28   : > { %p350_p11 = scmp.lt.s32.totalorder (!%p302_p9), %s1852_s24, 31  ;;  %s2431_s10 = scalar_lea.vmem (!%p302_p9), [#allocation5], %s1849_s14 }
  0x29   : > { %p1856_p12 = scmp.ne.s32.totalorder (!%p302_p9), %s2284_s17, 0 }
  0x2d   : > { %s2929_s13 = smov (!%p344_p10, %s1850_s13), 31  ;;  %s2931_s24 = smov (!%p350_p11, %s1852_s24), 31 }
  0x2e   : > { %s1851_s25 = sshll.u32 %s2929_s13, 2  ;;  %s1855_s26 = sshll.u32 %s2929_s13, 3  ;;  %vm367_vm0 = vcmask (!%p1856_p12), 7168   ;;  %v2302_v16 = vmov (!%p1856_p12), -inf   ;;  %v2303_v17 = vmov (!%p1856_p12), 0.0  }
  0x2f   : > { %s2419_s30 = scalar_lea.vmem %s2911_s0, %s1851_s25  ;;  %s2424_s7 = scalar_lea.vmem %s2915_s4, %s1855_s26  ;;  %368 = vst.msk [vmem:[#allocation2] sm:$0xff] (!%p1856_p12), %vm367_vm0, %v2302_v16  ;;  %369 = vst.msk [vmem:[#allocation2 + $0x8] sm:$0xff] (!%p1856_p12), %vm367_vm0, %v2302_v16 }
  0x30   : > { %s1853_s15 = sshll.u32 %s2931_s24, 2  ;;  %366 = sbr.rel (%p1856_p12) target bundleno = 71 (0x47), region = 81  ;;  %370 = vst.msk [vmem:[#allocation2 + $0x10] sm:$0xff] (!%p1856_p12), %vm367_vm0, %v2302_v16  ;;  %371 = vst.msk [vmem:[#allocation2 + $0x18] sm:$0xff] (!%p1856_p12), %vm367_vm0, %v2302_v16 }
  0x31   : > { %s2429_s9 = scalar_lea.vmem %s2912_s1, %s1853_s15  ;;  %372 = vst.msk [vmem:[#allocation2 + $0x20] sm:$0xff] (!%p1856_p12), %vm367_vm0, %v2302_v16  ;;  %373 = vst.msk [vmem:[#allocation2 + $0x28] sm:$0xff] (!%p1856_p12), %vm367_vm0, %v2302_v16 }
  0x32   : > { %374 = vst.msk [vmem:[#allocation2 + $0x30] sm:$0xff] (!%p1856_p12), %vm367_vm0, %v2302_v16  ;;  %375 = vst.msk [vmem:[#allocation2 + $0x38] sm:$0xff] (!%p1856_p12), %vm367_vm0, %v2302_v16 }
  0x33   : > { %376 = vst.msk [vmem:[#allocation2 + $0x40] sm:$0xff] (!%p1856_p12), %vm367_vm0, %v2302_v16  ;;  %377 = vst.msk [vmem:[#allocation2 + $0x48] sm:$0xff] (!%p1856_p12), %vm367_vm0, %v2302_v16 }
  0x34   : > { %378 = vst.msk [vmem:[#allocation2 + $0x50] sm:$0xff] (!%p1856_p12), %vm367_vm0, %v2302_v16  ;;  %379 = vst.msk [vmem:[#allocation2 + $0x58] sm:$0xff] (!%p1856_p12), %vm367_vm0, %v2302_v16 }
  0x35   : > { %380 = vst.msk [vmem:[#allocation2 + $0x60] sm:$0xff] (!%p1856_p12), %vm367_vm0, %v2302_v16  ;;  %381 = vst.msk [vmem:[#allocation2 + $0x68] sm:$0xff] (!%p1856_p12), %vm367_vm0, %v2302_v16 }
  0x36   : > { %382 = vst.msk [vmem:[#allocation2 + $0x70] sm:$0xff] (!%p1856_p12), %vm367_vm0, %v2302_v16  ;;  %383 = vst.msk [vmem:[#allocation2 + $0x78] sm:$0xff] (!%p1856_p12), %vm367_vm0, %v2302_v16 }
  0x37   : > { %384 = vst.msk [vmem:[#allocation3] sm:$0xff] %vm367_vm0, %v2303_v17  ;;  %385 = vst.msk [vmem:[#allocation3 + $0x8] sm:$0xff] %vm367_vm0, %v2303_v17 }
  0x38   : > { %386 = vst.msk [vmem:[#allocation3 + $0x10] sm:$0xff] %vm367_vm0, %v2303_v17  ;;  %387 = vst.msk [vmem:[#allocation3 + $0x18] sm:$0xff] %vm367_vm0, %v2303_v17 }
  0x39   : > { %388 = vst.msk [vmem:[#allocation3 + $0x20] sm:$0xff] %vm367_vm0, %v2303_v17  ;;  %389 = vst.msk [vmem:[#allocation3 + $0x28] sm:$0xff] %vm367_vm0, %v2303_v17 }
  0x3a   : > { %390 = vst.msk [vmem:[#allocation3 + $0x30] sm:$0xff] %vm367_vm0, %v2303_v17  ;;  %391 = vst.msk [vmem:[#allocation3 + $0x38] sm:$0xff] %vm367_vm0, %v2303_v17 }
  0x3b   : > { %392 = vst.msk [vmem:[#allocation3 + $0x40] sm:$0xff] %vm367_vm0, %v2303_v17  ;;  %393 = vst.msk [vmem:[#allocation3 + $0x48] sm:$0xff] %vm367_vm0, %v2303_v17 }
  0x3c   : > { %394 = vst.msk [vmem:[#allocation3 + $0x50] sm:$0xff] %vm367_vm0, %v2303_v17  ;;  %395 = vst.msk [vmem:[#allocation3 + $0x58] sm:$0xff] %vm367_vm0, %v2303_v17 }
  0x3d   : > { %396 = vst.msk [vmem:[#allocation3 + $0x60] sm:$0xff] %vm367_vm0, %v2303_v17  ;;  %397 = vst.msk [vmem:[#allocation3 + $0x68] sm:$0xff] %vm367_vm0, %v2303_v17 }
  0x3e   : > { %398 = vst.msk [vmem:[#allocation3 + $0x70] sm:$0xff] %vm367_vm0, %v2303_v17  ;;  %399 = vst.msk [vmem:[#allocation3 + $0x78] sm:$0xff] %vm367_vm0, %v2303_v17 }
  0x3f   : > { %400 = vst [vmem:[#allocation4] sm:$0xff] %v2303_v17  ;;  %401 = vst [vmem:[#allocation4 + $0x8] sm:$0xff] %v2303_v17 }
  0x40   : > { %402 = vst [vmem:[#allocation4 + $0x10] sm:$0xff] %v2303_v17  ;;  %403 = vst [vmem:[#allocation4 + $0x18] sm:$0xff] %v2303_v17 }
  0x41   : > { %404 = vst [vmem:[#allocation4 + $0x20] sm:$0xff] %v2303_v17  ;;  %405 = vst [vmem:[#allocation4 + $0x28] sm:$0xff] %v2303_v17 }
  0x42   : > { %406 = vst [vmem:[#allocation4 + $0x30] sm:$0xff] %v2303_v17  ;;  %407 = vst [vmem:[#allocation4 + $0x38] sm:$0xff] %v2303_v17 }
  0x43   : > { %408 = vst [vmem:[#allocation4 + $0x40] sm:$0xff] %v2303_v17  ;;  %409 = vst [vmem:[#allocation4 + $0x48] sm:$0xff] %v2303_v17 }
  0x44   : > { %410 = vst [vmem:[#allocation4 + $0x50] sm:$0xff] %v2303_v17  ;;  %411 = vst [vmem:[#allocation4 + $0x58] sm:$0xff] %v2303_v17 }
  0x45   : > { %412 = vst [vmem:[#allocation4 + $0x60] sm:$0xff] %v2303_v17  ;;  %413 = vst [vmem:[#allocation4 + $0x68] sm:$0xff] %v2303_v17 }
  0x46   : > { %414 = vst [vmem:[#allocation4 + $0x70] sm:$0xff] %v2303_v17  ;;  %415 = vst [vmem:[#allocation4 + $0x78] sm:$0xff] %v2303_v17 }
  0x47 PF: > { %v2469_v18 = vld [vmem:[%s2914_s3] sm:$0x1]  ;;  %v2304_v20 = vmov 0.0   ;;  %vm2305_vm1 = vmmov 0   ;;  %v2306_v21 = vmov 0   ;;  %v2101_v22 = vld [vmem:[%s2419_s30 + $0x8] sm:$0xff]   ;;  %v762_v57 = vlaneseq }
  0x48   : > { %1966 = vmatprep.subr.bf16.mxu0 %v2469_v18  ;;  %v2100_v19 = vld [vmem:[%s2419_s30] sm:$0xff]   ;;  %1984 = vmatprep.subr.bf16.mxu1 %v2304_v20  ;;  %v2102_v23 = vld [vmem:[%s2419_s30 + $0x10] sm:$0xff]   ;;  %v2109_v25 = vld [vmem:[%s2429_s9 + $0x8] sm:$0xff]   ;;  %p1873_p13 = scmp.ne.s32.totalorder %s2284_s17, 1 }
  0x49   : > { %1967 = vmatpush3.bf16.xpose.msra.mxu0 %v2469_v18  ;;  %1968 = vmatprep.mubr.bf16.mxu0 %v2100_v19  ;;  %v2108_v24 = vld [vmem:[%s2429_s9] sm:$0xff]   ;;  %v2103_v26 = vld [vmem:[%s2419_s30 + $0x18] sm:$0xff]   ;;  %v2110_v28 = vld [vmem:[%s2429_s9 + $0x10] sm:$0xff]   ;;  %v763_v58 = vshrl.u32 %v762_v57, 7 }
  0x4a   : > { %2000 = vmatprep.mubr.msk.bf16.mxu1 %vm2305_vm1, %v2304_v20  ;;  %2099 = vset.pattern.permute.xlu1 %v2306_v21  ;;  %v2104_v27 = vld [vmem:[%s2419_s30 + $0x20] sm:$0xff]   ;;  %v2111_v29 = vld [vmem:[%s2429_s9 + $0x18] sm:$0xff]   ;;  %v2105_v30 = vld [vmem:[%s2419_s30 + $0x28] sm:$0xff]  }
  0x4b   : > { %2098 = vset.pattern.permute.xlu0 %v2306_v21  ;;  %1985 = vmatpush3.bf16.xpose.msra.mxu1 %v2108_v24  ;;  %v2106_v31 = vld [vmem:[%s2419_s30 + $0x30] sm:$0xff]   ;;  %v2112_v32 = vld [vmem:[%s2429_s9 + $0x20] sm:$0xff]   ;;  %v2113_v33 = vld [vmem:[%s2429_s9 + $0x28] sm:$0xff]   ;;  %v764_v59 = vsub.s32 1, %v763_v58 }
  0x4c   : > { %2004 = vmatprep.subr.bf16.mxu0 %v2108_v24  ;;  %1986 = vmatprep.subr.bf16.mxu1 %v2304_v20  ;;  %v2107_v34 = vld [vmem:[%s2419_s30 + $0x38] sm:$0xff]   ;;  %v2114_v35 = vld [vmem:[%s2429_s9 + $0x30] sm:$0xff]   ;;  %v1894_v62 = vld [vmem:[%s2431_s10] sm:$0xff]  }
  0x4d   : > { %v2115_v36 = vld [vmem:[%s2429_s9 + $0x38] sm:$0xff]   ;;  %v1895_v2 = vunpack.c.l.bf16 %v1894_v62  ;;  %v1925_v6 = vld [vmem:[%s2431_s10 + $0x8] sm:$0xff]   ;;  %v1896_v13 = vunpack.c.h.bf16 %v1894_v62  ;;  %v1926_v17 = vld [vmem:[%s2431_s10 + $0x10] sm:$0xff]  }
  0x4e   : > { %v1899_v12 = vunpack.c.l.bf16 %v1925_v6 }
  0x50   : > { %1969 = vmatmul.mubr.bf16.vlgmr.msra.gmra.mrb[0].mxu0 %v2101_v22 }
  0x51   : > { %1972 = vmatprep.mubr.bf16.mxu0 %v2102_v23  ;;  %2005 = vmatpush3.bf16.msra.mxu0 %v2108_v24  ;;  %v1900_v24 = vunpack.c.h.bf16 %v1925_v6 }
  0x52   : > { %2006 = vmatprep.subr.bf16.mxu0 %v2109_v25 }
  0x53   : > { %1987 = vmatpush3.bf16.xpose.msra.mxu1 %v2109_v25 }
  0x54   : > { %1988 = vmatprep.subr.bf16.mxu1 %v2304_v20 }
  0x55   : > { %2007 = vmatpush3.bf16.msra.mxu0 %v2109_v25  ;;  %v1903_v25 = vunpack.c.l.bf16 %v1926_v17 }
  0x56   : > { %2008 = vmatprep.subr.bf16.mxu0 %v2110_v28 }
  0x58   : > { %1973 = vmatmul.mubr.bf16.gmra.mrb[4].mxu0 %v2103_v26 }
  0x59   : > { %1976 = vmatprep.mubr.bf16.mxu0 %v2104_v27  ;;  %2009 = vmatpush3.bf16.msra.mxu0 %v2110_v28 }
  0x5a   : > { %2010 = vmatprep.subr.bf16.mxu0 %v2111_v29 }
  0x5b   : > { %1989 = vmatpush3.bf16.xpose.msra.mxu1 %v2110_v28 }
  0x5c   : > { %1990 = vmatprep.subr.bf16.mxu1 %v2304_v20 }
  0x5d   : > { %2011 = vmatpush3.bf16.msra.mxu0 %v2111_v29 }
  0x5e   : > { %2012 = vmatprep.subr.bf16.mxu0 %v2112_v32 }
  0x60   : > { %1977 = vmatmul.mubr.bf16.gmra.mrb[8].mxu0 %v2105_v30 }
  0x61   : > { %1980 = vmatprep.mubr.bf16.mxu0 %v2106_v31  ;;  %2013 = vmatpush3.bf16.msra.mxu0 %v2112_v32 }
  0x62   : > { %2014 = vmatprep.subr.bf16.mxu0 %v2113_v33 }
  0x63   : > { %1991 = vmatpush3.bf16.xpose.msra.mxu1 %v2111_v29  ;;  %v1927_v29 = vld [vmem:[%s2431_s10 + $0x18] sm:$0xff]  }
  0x64   : > { %1992 = vmatprep.subr.bf16.mxu1 %v2304_v20 }
  0x65   : > { %2015 = vmatpush3.bf16.msra.mxu0 %v2113_v33 }
  0x66   : > { %2016 = vmatprep.subr.bf16.mxu0 %v2114_v35 }
  0x68   : > { %1981 = vmatmul.mubr.bf16.gmra.mrb[12].mxu0 %v2107_v34 }
  0x69   : > { %2017 = vmatpush3.bf16.msra.mxu0 %v2114_v35 }
  0x6a   : > { %2018 = vmatprep.subr.bf16.mxu0 %v2115_v36 }
  0x6b   : > { %1993 = vmatpush3.bf16.xpose.msra.mxu1 %v2112_v32 }
  0x6c   : > { %1994 = vmatprep.subr.bf16.mxu1 %v2304_v20 }
  0x6d   : > { %2019 = vmatpush3.bf16.msra.mxu0 %v2115_v36 }
  0x73   : > { %1995 = vmatpush3.bf16.xpose.msra.mxu1 %v2113_v33 }
  0x74   : > { %1996 = vmatprep.subr.bf16.mxu1 %v2304_v20 }
  0x7b   : > { %1997 = vmatpush3.bf16.xpose.msra.mxu1 %v2114_v35 }
  0x7c   : > { %1998 = vmatprep.subr.bf16.mxu1 %v2304_v20 }
  0x83   : > { %1999 = vmatpush3.bf16.xpose.msra.mxu1 %v2115_v36 }
  0x8a   : > { %2001 = vmatmul.mubr.bf16.vlgmr.msra.gmra.mrb[0].mxu1 %v2469_v18 }
 0x123   : > { %v1970_v37 = vpop.f32.mrb[0].mxu0 }
 0x124   : > { %694 = vperm.xlu1 %2099, %v1970_v37   ;;  %v531_v38 = vpop.f32.mrb[1].mxu0  ;;  %v1904_v37 = vunpack.c.h.bf16 %v1926_v17 }
 0x125   : > { %684 = vperm.xlu0 %2098, %v531_v38   ;;  %v1971_v39 = vpop.f32.mrb[2].mxu0  ;;  %v1907_v38 = vunpack.c.l.bf16 %v1927_v29 }
 0x126   : > { %v534_v40 = vpop.f32.mrb[3].mxu0 }
 0x128   : > { %699 = vperm.xlu1 %2099, %v1971_v39  }
 0x129   : > { %689 = vperm.xlu0 %2098, %v534_v40  }
 0x12b   : > { %v1974_v41 = vpop.f32.mrb[4].mxu0 }
 0x12c   : > { %v547_v42 = vpop.f32.mrb[5].mxu0 }
 0x12d   : > { %704 = vperm.xlu0 %2098, %v547_v42   ;;  %v1975_v43 = vpop.f32.mrb[6].mxu0  ;;  %v1928_v42 = vld [vmem:[%s2431_s10 + $0x20] sm:$0xff]  }
 0x12e   : > { %v550_v44 = vpop.f32.mrb[7].mxu0 }
 0x12f   : > { %709 = vperm.xlu1 %2099, %v550_v44  }
 0x131   : > { %714 = vperm.xlu0 %2098, %v1974_v41  }
 0x133   : > { %719 = vperm.xlu1 %2099, %v1975_v43   ;;  %v1978_v45 = vpop.f32.mrb[8].mxu0 }
 0x134   : > { %v563_v46 = vpop.f32.mrb[9].mxu0 }
 0x135   : > { %724 = vperm.xlu0 %2098, %v563_v46   ;;  %v1979_v47 = vpop.f32.mrb[10].mxu0 }
 0x136   : > { %v566_v48 = vpop.f32.mrb[11].mxu0 }
 0x137   : > { %729 = vperm.xlu1 %2099, %v566_v48  }
 0x139   : > { %734 = vperm.xlu0 %2098, %v1978_v45  }
 0x13b   : > { %739 = vperm.xlu1 %2099, %v1979_v47   ;;  %v1982_v49 = vpop.f32.mrb[12].mxu0 }
 0x13c   : > { %v579_v50 = vpop.f32.mrb[13].mxu0 }
 0x13d   : > { %744 = vperm.xlu0 %2098, %v579_v50   ;;  %v1983_v51 = vpop.f32.mrb[14].mxu0  ;;  %v1908_v50 = vunpack.c.h.bf16 %v1927_v29 }
 0x13e   : > { %v582_v52 = vpop.f32.mrb[15].mxu0 }
 0x13f   : > { %749 = vperm.xlu1 %2099, %v582_v52  }
 0x141   : > { %754 = vperm.xlu0 %2098, %v1982_v49  }
 0x143   : > { %759 = vperm.xlu1 %2099, %v1983_v51   ;;  %v1911_v51 = vunpack.c.l.bf16 %v1928_v42 }
 0x15d   : > { %v676_v53 = vpop.f32.mrb[0].mxu1 }
 0x15e   : > { %v2002_v54 = vpop.f32.mrb[1].mxu1  ;;  %v2490_v60 = vrot.slane %v676_v53, %v764_v59 }
 0x15f   : > { %v679_v55 = vpop.f32.mrb[2].mxu1 }
 0x160   : > { %v2003_v56 = vpop.f32.mrb[3].mxu1  ;;  %v1929_v55 = vld [vmem:[%s2431_s10 + $0x28] sm:$0xff]  }
 0x1a3   : > { %v695_v61 = vpop.permute.xlu1 %694 }
 0x1a4   : > { %v768_v63 = vadd.f32 %v2490_v60, %v695_v61  ;;  %v685_v0 = vpop.permute.xlu0 %684 }
 0x1a5   : > { %v766_v1 = vadd.f32 %v2490_v60, %v685_v0  ;;  %v1912_v0 = vunpack.c.h.bf16 %v1928_v42  ;;  %v878_v42 = vld [vmem:[#allocation2] sm:$0xff] }
 0x1a6   : > { %v800_v3 = vmul.f32 0.2, %v768_v63  ;;  %vm784_vm3 = vcmp.gt.f32.partialorder %v768_v63, 0.0 }
 0x1a7   : > { %v798_v4 = vmul.f32 0.2, %v766_v1  ;;  %v700_v5 = vpop.permute.xlu1 %699  ;;  %vm782_vm2 = vcmp.gt.f32.partialorder %v766_v1, 0.0 }
 0x1a8   : > { %v769_v7 = vadd.f32 %v2490_v60, %v700_v5  ;;  %v690_v8 = vpop.permute.xlu0 %689  ;;  %v816_v16 = vsel %vm784_vm3, %v768_v63, %v800_v3  ;;  %v1930_v5 = vld [vmem:[%s2431_s10 + $0x30] sm:$0xff]  }
 0x1a9   : > { %v767_v9 = vadd.f32 %v2490_v60, %v690_v8  ;;  %v814_v10 = vsel %vm782_vm2, %v766_v1, %v798_v4  ;;  %v2503_v22 = vadd.f32 %v1899_v12, %v816_v16  ;;  %v1915_v1 = vunpack.c.l.bf16 %v1929_v55 }
 0x1aa   : > { %v2498_v11 = vadd.f32 %v1895_v2, %v814_v10  ;;  %v801_v14 = vmul.f32 0.2, %v769_v7  ;;  %vm785_vm5 = vcmp.gt.f32.partialorder %v769_v7, 0.0  ;;  %vm1198_vm2 = vcmask 7168  }
 0x1ab   : > { %v799_v15 = vmul.f32 0.2, %v767_v9  ;;  %vm783_vm4 = vcmp.gt.f32.partialorder %v767_v9, 0.0 }
 0x1ac   : > { %v705_v18 = vpop.permute.xlu0 %704  ;;  %894 = vmax.xlane.f32.xlu0 %v2498_v11  ;;  %v817_v28 = vsel %vm785_vm5, %v769_v7, %v801_v14  ;;  %v1916_v14 = vunpack.c.h.bf16 %v1929_v55 }
 0x1ad   : > { %v770_v19 = vadd.f32 %v2490_v60, %v705_v18  ;;  %v815_v20 = vsel %vm783_vm4, %v767_v9, %v799_v15  ;;  %v2512_v35 = vadd.f32 %v1900_v24, %v817_v28  ;;  %v1919_v15 = vunpack.c.l.bf16 %v1930_v5 }
 0x1ae   : > { %v710_v21 = vpop.permute.xlu1 %709  ;;  %v2505_v23 = vadd.f32 %v1896_v13, %v815_v20 }
 0x1af   : > { %v802_v26 = vmul.f32 0.2, %v770_v19  ;;  %v771_v27 = vadd.f32 %v2490_v60, %v710_v21  ;;  %vm786_vm6 = vcmp.gt.f32.partialorder %v770_v19, 0.0 }
 0x1b0   : > { %v715_v30 = vpop.permute.xlu0 %714  ;;  %898 = vmax.xlane.f32.xlu0 %v2503_v22  ;;  %896 = vmax.xlane.f32.xlu1 %v2505_v23 }
 0x1b1   : > { %v803_v31 = vmul.f32 0.2, %v771_v27  ;;  %v772_v32 = vadd.f32 %v2490_v60, %v715_v30  ;;  %v818_v33 = vsel %vm786_vm6, %v770_v19, %v802_v26  ;;  %vm787_vm7 = vcmp.gt.f32.partialorder %v771_v27, 0.0  ;;  %v1931_v19 = vld [vmem:[%s2431_s10 + $0x38] sm:$0xff]  }
 0x1b2   : > { %v720_v34 = vpop.permute.xlu1 %719  ;;  %v2514_v36 = vadd.f32 %v1903_v25, %v818_v33  ;;  %v1923_v29 = vunpack.c.l.bf16 %v1931_v19  ;;  %v1920_v30 = vunpack.c.h.bf16 %v1930_v5  ;;  %v2590_v5 = vld [vmem:[#allocation2 + $0x40] sm:$0xff] }
 0x1b3   : > { %v804_v39 = vmul.f32 0.2, %v772_v32  ;;  %v773_v40 = vadd.f32 %v2490_v60, %v720_v34  ;;  %v819_v41 = vsel %vm787_vm7, %v771_v27, %v803_v31  ;;  %vm788_vm8 = vcmp.gt.f32.partialorder %v772_v32, 0.0 }
 0x1b4   : > { %v725_v43 = vpop.permute.xlu0 %724  ;;  %900 = vmax.xlane.f32.xlu0 %v2512_v35  ;;  %902 = vmax.xlane.f32.xlu1 %v2514_v36  ;;  %v2521_v48 = vadd.f32 %v1904_v37, %v819_v41 }
 0x1b5   : > { %v805_v44 = vmul.f32 0.2, %v773_v40  ;;  %v774_v45 = vadd.f32 %v2490_v60, %v725_v43  ;;  %v820_v46 = vsel %vm788_vm8, %v772_v32, %v804_v39  ;;  %vm789_vm9 = vcmp.gt.f32.partialorder %v773_v40, 0.0 }
 0x1b6   : > { %v730_v47 = vpop.permute.xlu1 %729  ;;  %v2523_v49 = vadd.f32 %v1907_v38, %v820_v46  ;;  %v879_v46 = vld [vmem:[#allocation2 + $0x8] sm:$0xff] }
 0x1b7   : > { %v806_v52 = vmul.f32 0.2, %v774_v45  ;;  %v775_v53 = vadd.f32 %v2490_v60, %v730_v47  ;;  %v821_v54 = vsel %vm789_vm9, %v773_v40, %v805_v44  ;;  %vm790_vm10 = vcmp.gt.f32.partialorder %v774_v45, 0.0 }
 0x1b8   : > { %v735_v56 = vpop.permute.xlu0 %734  ;;  %904 = vmax.xlane.f32.xlu0 %v2521_v48  ;;  %906 = vmax.xlane.f32.xlu1 %v2523_v49  ;;  %v2530_v62 = vadd.f32 %v1908_v50, %v821_v54  ;;  %v1924_v40 = vunpack.c.h.bf16 %v1931_v19  ;;  %v882_v54 = vld [vmem:[#allocation2 + $0x20] sm:$0xff] }
 0x1b9   : > { %v807_v57 = vmul.f32 0.2, %v775_v53  ;;  %v776_v58 = vadd.f32 %v2490_v60, %v735_v56  ;;  %v822_v59 = vsel %vm790_vm10, %v774_v45, %v806_v52  ;;  %vm791_vm11 = vcmp.gt.f32.partialorder %v775_v53, 0.0  ;;  %v2564_v45 = vld [vmem:[#allocation2 + $0x10] sm:$0xff] }
 0x1ba   : > { %v740_v61 = vpop.permute.xlu1 %739  ;;  %v2532_v63 = vadd.f32 %v1911_v51, %v822_v59  ;;  %v2579_v59 = vld [vmem:[#allocation2 + $0x28] sm:$0xff] }
 0x1bb   : > { %v808_v2 = vmul.f32 0.2, %v776_v58  ;;  %v777_v3 = vadd.f32 %v2490_v60, %v740_v61  ;;  %v823_v4 = vsel %vm791_vm11, %v775_v53, %v807_v57  ;;  %vm792_vm12 = vcmp.gt.f32.partialorder %v776_v58, 0.0  ;;  %v2570_v53 = vld [vmem:[#allocation2 + $0x18] sm:$0xff]  ;;  %v884_v61 = vld [vmem:[#allocation2 + $0x30] sm:$0xff] }
 0x1bc   : > { %908 = vmax.xlane.f32.xlu0 %v2530_v62  ;;  %v745_v6 = vpop.permute.xlu0 %744  ;;  %910 = vmax.xlane.f32.xlu1 %v2532_v63  ;;  %v2539_v12 = vadd.f32 %v1912_v0, %v823_v4  ;;  %v2588_v4 = vld [vmem:[#allocation2 + $0x38] sm:$0xff] }
 0x1bd   : > { %v809_v7 = vmul.f32 0.2, %v777_v3  ;;  %v778_v8 = vadd.f32 %v2490_v60, %v745_v6  ;;  %v824_v9 = vsel %vm792_vm12, %v776_v58, %v808_v2  ;;  %vm793_vm13 = vcmp.gt.f32.partialorder %v777_v3, 0.0 }
 0x1be   : > { %v750_v10 = vpop.permute.xlu1 %749  ;;  %v2541_v13 = vadd.f32 %v1915_v1, %v824_v9 }
 0x1bf   : > { %v810_v16 = vmul.f32 0.2, %v778_v8  ;;  %v779_v17 = vadd.f32 %v2490_v60, %v750_v10  ;;  %v825_v18 = vsel %vm793_vm13, %v777_v3, %v809_v7  ;;  %vm794_vm14 = vcmp.gt.f32.partialorder %v778_v8, 0.0 }
 0x1c0   : > { %912 = vmax.xlane.f32.xlu0 %v2539_v12  ;;  %v755_v20 = vpop.permute.xlu0 %754  ;;  %914 = vmax.xlane.f32.xlu1 %v2541_v13  ;;  %v2548_v27 = vadd.f32 %v1916_v14, %v825_v18  ;;  %v2602_v14 = vld [vmem:[#allocation2 + $0x48] sm:$0xff] }
 0x1c1   : > { %v811_v21 = vmul.f32 0.2, %v779_v17  ;;  %v780_v24 = vadd.f32 %v2490_v60, %v755_v20  ;;  %v826_v25 = vsel %vm794_vm14, %v778_v8, %v810_v16  ;;  %vm795_vm15 = vcmp.gt.f32.partialorder %v779_v17, 0.0 }
 0x1c2   : > { %v760_v26 = vpop.permute.xlu1 %759  ;;  %v2550_v28 = vadd.f32 %v1919_v15, %v826_v25  ;;  %v888_v15 = vld [vmem:[#allocation2 + $0x50] sm:$0xff]  ;;  %v2613_v25 = vld [vmem:[#allocation2 + $0x58] sm:$0xff] }
 0x1c3   : > { %v812_v31 = vmul.f32 0.2, %v780_v24  ;;  %v781_v32 = vadd.f32 %v2490_v60, %v760_v26  ;;  %vm796_vm0 = vcmp.gt.f32.partialorder %v780_v24, 0.0  ;;  %v827_v33 = vsel %vm795_vm15, %v779_v17, %v811_v21  ;;  %v2615_v26 = vld [vmem:[#allocation2 + $0x60] sm:$0xff] }
 0x1c4   : > { %916 = vmax.xlane.f32.xlu0 %v2548_v27  ;;  %918 = vmax.xlane.f32.xlu1 %v2550_v28  ;;  %v2557_v39 = vadd.f32 %v1920_v30, %v827_v33 }
 0x1c5   : > { %v813_v34 = vmul.f32 0.2, %v781_v32  ;;  %v828_v37 = vsel %vm796_vm0, %v780_v24, %v812_v31  ;;  %vm797_vm1 = vcmp.gt.f32.partialorder %v781_v32, 0.0 }
 0x1c6   : > { %v2555_v38 = vadd.f32 %v1923_v29, %v828_v37 }
 0x1c7   : > { %v829_v41 = vsel %vm797_vm1, %v781_v32, %v813_v34 }
 0x1c8   : > { %922 = vmax.xlane.f32.xlu1 %v2555_v38  ;;  %920 = vmax.xlane.f32.xlu0 %v2557_v39  ;;  %v2561_v60 = vadd.f32 %v1924_v40, %v829_v41  ;;  %v2625_v41 = vld [vmem:[#allocation2 + $0x68] sm:$0xff] }
 0x1cc   : > { %924 = vmax.xlane.f32.xlu0 %v2561_v60 }
 0x239   : > { %v895_v43 = vpop.xlane.xlu0 %894 }
 0x23a   : > { %v926_v44 = vmax.f32 %v878_v42, %v895_v43 }
 0x23c   : > { %1464 = vst.msk [vmem:[#allocation2] sm:$0xff] %vm1198_vm2, %v926_v44  ;;  %992 = vperm.xlu1 %2099, %v926_v44   ;;  %v942_v16 = vsub.f32 %v878_v42, %v926_v44  ;;  %v2627_v42 = vld [vmem:[#allocation2 + $0x70] sm:$0xff] }
 0x23d   : > { %v899_v47 = vpop.xlane.xlu0 %898  ;;  %v897_v50 = vpop.xlane.xlu1 %896 }
 0x23e   : > { %v2568_v51 = vmax.f32 %v2564_v45, %v899_v47  ;;  %v927_v52 = vmax.f32 %v879_v46, %v897_v50  ;;  %v958_v29 = vmul.f32 1.442695, %v942_v16 }
 0x240   : > { %1466 = vst.msk [vmem:[#allocation2 + $0x10] sm:$0xff] %vm1198_vm2, %v2568_v51  ;;  %1465 = vst.msk [vmem:[#allocation2 + $0x8] sm:$0xff] %vm1198_vm2, %v927_v52  ;;  %1002 = vperm.xlu1 %2099, %v2568_v51   ;;  %997 = vperm.xlu0 %2098, %v927_v52   ;;  %v943_v6 = vsub.f32 %v879_v46, %v927_v52  ;;  %v944_v30 = vsub.f32 %v2564_v45, %v2568_v51 }
 0x241   : > { %v901_v55 = vpop.xlane.xlu0 %900  ;;  %v903_v56 = vpop.xlane.xlu1 %902 }
 0x242   : > { %v2577_v57 = vmax.f32 %v2570_v53, %v901_v55  ;;  %v930_v58 = vmax.f32 %v882_v54, %v903_v56  ;;  %v960_v17 = vmul.f32 1.442695, %v943_v6  ;;  %v962_v43 = vmul.f32 1.442695, %v944_v30 }
 0x244   : > { %1467 = vst.msk [vmem:[#allocation2 + $0x18] sm:$0xff] %vm1198_vm2, %v2577_v57  ;;  %1468 = vst.msk [vmem:[#allocation2 + $0x20] sm:$0xff] %vm1198_vm2, %v930_v58  ;;  %1007 = vperm.xlu1 %2099, %v2577_v57   ;;  %1012 = vperm.xlu0 %2098, %v930_v58   ;;  %v946_v18 = vsub.f32 %v882_v54, %v930_v58  ;;  %2116 = vpow2.f32 %v960_v17  ;;  %v945_v44 = vsub.f32 %v2570_v53, %v2577_v57  ;;  %v2637_v54 = vld [vmem:[#allocation2 + $0x78] sm:$0xff] }
 0x245   : > { %v905_v0 = vpop.xlane.xlu0 %904  ;;  %v907_v1 = vpop.xlane.xlu1 %906  ;;  %2118 = vpow2.f32 %v958_v29 }
 0x246   : > { %v2586_v2 = vmax.f32 %v2579_v59, %v905_v0  ;;  %v932_v3 = vmax.f32 %v884_v61, %v907_v1  ;;  %v966_v31 = vmul.f32 1.442695, %v946_v18  ;;  %v964_v53 = vmul.f32 1.442695, %v945_v44 }
 0x248   : > { %1469 = vst.msk [vmem:[#allocation2 + $0x28] sm:$0xff] %vm1198_vm2, %v2586_v2  ;;  %1470 = vst.msk [vmem:[#allocation2 + $0x30] sm:$0xff] %vm1198_vm2, %v932_v3  ;;  %1017 = vperm.xlu1 %2099, %v2586_v2   ;;  %1022 = vperm.xlu0 %2098, %v932_v3   ;;  %v948_v32 = vsub.f32 %v884_v61, %v932_v3  ;;  %2120 = vpow2.f32 %v966_v31  ;;  %v947_v55 = vsub.f32 %v2579_v59, %v2586_v2 }
 0x249   : > { %v909_v7 = vpop.xlane.xlu0 %908  ;;  %v911_v8 = vpop.xlane.xlu1 %910  ;;  %2122 = vpow2.f32 %v962_v43 }
 0x24a   : > { %v2597_v9 = vmax.f32 %v2588_v4, %v909_v7  ;;  %v2600_v10 = vmax.f32 %v2590_v5, %v911_v8  ;;  %v970_v45 = vmul.f32 1.442695, %v948_v32  ;;  %v968_v1 = vmul.f32 1.442695, %v947_v55 }
 0x24c   : > { %1471 = vst.msk [vmem:[#allocation2 + $0x38] sm:$0xff] %vm1198_vm2, %v2597_v9  ;;  %1472 = vst.msk [vmem:[#allocation2 + $0x40] sm:$0xff] %vm1198_vm2, %v2600_v10  ;;  %1027 = vperm.xlu1 %2099, %v2597_v9   ;;  %1032 = vperm.xlu0 %2098, %v2600_v10   ;;  %2124 = vpow2.f32 %v970_v45  ;;  %v950_v57 = vsub.f32 %v2590_v5, %v2600_v10  ;;  %v949_v2 = vsub.f32 %v2588_v4, %v2597_v9 }
 0x24d   : > { %v913_v19 = vpop.xlane.xlu0 %912  ;;  %v915_v20 = vpop.xlane.xlu1 %914  ;;  %2126 = vpow2.f32 %v964_v53 }
 0x24e   : > { %v2611_v21 = vmax.f32 %v2602_v14, %v913_v19  ;;  %v936_v24 = vmax.f32 %v888_v15, %v915_v20  ;;  %v2652_v59 = vpop.eup %2116  ;;  %v974_v5 = vmul.f32 1.442695, %v950_v57  ;;  %v972_v4 = vmul.f32 1.442695, %v949_v2 }
 0x24f   : > { %v2663_v7 = vpop.eup %2118 }
 0x250   : > { %1473 = vst.msk [vmem:[#allocation2 + $0x48] sm:$0xff] %vm1198_vm2, %v2611_v21  ;;  %1474 = vst.msk [vmem:[#allocation2 + $0x50] sm:$0xff] %vm1198_vm2, %v936_v24  ;;  %1037 = vperm.xlu1 %2099, %v2611_v21   ;;  %1042 = vperm.xlu0 %2098, %v936_v24   ;;  %v952_v46 = vsub.f32 %v888_v15, %v936_v24  ;;  %v951_v17 = vsub.f32 %v2602_v14, %v2611_v21 }
 0x251   : > { %v917_v33 = vpop.xlane.xlu0 %916  ;;  %v919_v34 = vpop.xlane.xlu1 %918 }
 0x252   : > { %v937_v37 = vmax.f32 %v2613_v25, %v917_v33  ;;  %v938_v40 = vmax.f32 %v2615_v26, %v919_v34  ;;  %v978_v58 = vmul.f32 1.442695, %v952_v46  ;;  %v2665_v8 = vpop.eup %2120  ;;  %v976_v24 = vmul.f32 1.442695, %v951_v17 }
 0x253   : > { %v2670_v15 = vpop.eup %2122 }
 0x254   : > { %1475 = vst.msk [vmem:[#allocation2 + $0x58] sm:$0xff] %vm1198_vm2, %v937_v37  ;;  %1476 = vst.msk [vmem:[#allocation2 + $0x60] sm:$0xff] %vm1198_vm2, %v938_v40  ;;  %1047 = vperm.xlu1 %2099, %v937_v37   ;;  %1052 = vperm.xlu0 %2098, %v938_v40   ;;  %2128 = vpow2.f32 %v978_v58  ;;  %v954_v6 = vsub.f32 %v2615_v26, %v938_v40  ;;  %v953_v9 = vsub.f32 %v2613_v25, %v937_v37 }
 0x255   : > { %v921_v47 = vpop.xlane.xlu0 %920  ;;  %v923_v50 = vpop.xlane.xlu1 %922  ;;  %2130 = vpow2.f32 %v968_v1 }
 0x256   : > { %v939_v51 = vmax.f32 %v2625_v41, %v921_v47  ;;  %v2635_v52 = vmax.f32 %v2627_v42, %v923_v50  ;;  %2132 = vpow2.f32 %v974_v5  ;;  %v982_v10 = vmul.f32 1.442695, %v954_v6  ;;  %v2672_v16 = vpop.eup %2124 }
 0x257   : > { %2134 = vpow2.f32 %v972_v4  ;;  %v980_v18 = vmul.f32 1.442695, %v953_v9  ;;  %v2678_v19 = vpop.eup %2126 }
 0x258   : > { %1477 = vst.msk [vmem:[#allocation2 + $0x68] sm:$0xff] %vm1198_vm2, %v939_v51  ;;  %v956_v56 = vsub.f32 %v2627_v42, %v2635_v52  ;;  %1478 = vst.msk [vmem:[#allocation2 + $0x70] sm:$0xff] %vm1198_vm2, %v2635_v52  ;;  %1057 = vperm.xlu1 %2099, %v939_v51   ;;  %1062 = vperm.xlu0 %2098, %v2635_v52   ;;  %2136 = vpow2.f32 %v982_v10  ;;  %v955_v25 = vsub.f32 %v2625_v41, %v939_v51 }
 0x259   : > { %v925_v61 = vpop.xlane.xlu0 %924  ;;  %2138 = vpow2.f32 %v980_v18 }
 0x25a   : > { %v2650_v0 = vmax.f32 %v2637_v54, %v925_v61  ;;  %2140 = vpow2.f32 %v976_v24  ;;  %v984_v14 = vmul.f32 1.442695, %v955_v25 }
 0x25c   : > { %v957_v3 = vsub.f32 %v2637_v54, %v2650_v0  ;;  %1479 = vst.msk [vmem:[#allocation2 + $0x78] sm:$0xff] %vm1198_vm2, %v2650_v0  ;;  %1067 = vperm.xlu1 %2099, %v2650_v0   ;;  %1238 = vperm.xlu0 %2098, %v2652_v59   ;;  %2142 = vpow2.f32 %v984_v14 }
 0x25e   : > { %v2680_v20 = vpop.eup %2128 }
 0x25f   : > { %v2685_v26 = vpop.eup %2130 }
 0x260   : > { %1233 = vperm.xlu1 %2099, %v2663_v7   ;;  %1253 = vperm.xlu0 %2098, %v2665_v8   ;;  %v2687_v29 = vpop.eup %2132 }
 0x261   : > { %v2691_v21 = vpop.eup %2134 }
 0x262   : > { %v2693_v30 = vpop.eup %2136 }
 0x263   : > { %v2697_v31 = vpop.eup %2138 }
 0x264   : > { %1243 = vperm.xlu1 %2099, %v2670_v15   ;;  %1263 = vperm.xlu0 %2098, %v2672_v16   ;;  %v2700_v32 = vpop.eup %2140 }
 0x266   : > { %v2703_v33 = vpop.eup %2142 }
 0x268   : > { %1248 = vperm.xlu1 %2099, %v2678_v19   ;;  %1283 = vperm.xlu0 %2098, %v2680_v20  }
 0x26c   : > { %1258 = vperm.xlu1 %2099, %v2685_v26   ;;  %1273 = vperm.xlu0 %2098, %v2687_v29  }
 0x270   : > { %1268 = vperm.xlu1 %2099, %v2691_v21   ;;  %1293 = vperm.xlu0 %2098, %v2693_v30  }
 0x274   : > { %1288 = vperm.xlu1 %2099, %v2697_v31  }
 0x278   : > { %1278 = vperm.xlu1 %2099, %v2700_v32  }
 0x27c   : > { %1298 = vperm.xlu1 %2099, %v2703_v33  }
 0x2bb   : > { %v993_v34 = vpop.permute.xlu1 %992 }
 0x2bc   : > { %v1070_v37 = vsub.f32 %v2498_v11, %v993_v34 }
 0x2be   : > { %v1086_v40 = vmul.f32 1.442695, %v1070_v37 }
 0x2bf   : > { %v998_v41 = vpop.permute.xlu0 %997  ;;  %v1003_v43 = vpop.permute.xlu1 %1002 }
 0x2c0   : > { %v1071_v44 = vsub.f32 %v2505_v23, %v998_v41  ;;  %v1072_v45 = vsub.f32 %v2503_v22, %v1003_v43  ;;  %2144 = vpow2.f32 %v1086_v40 }
 0x2c2   : > { %v1088_v46 = vmul.f32 1.442695, %v1071_v44  ;;  %v1090_v47 = vmul.f32 1.442695, %v1072_v45 }
 0x2c3   : > { %v1013_v50 = vpop.permute.xlu0 %1012  ;;  %v1008_v51 = vpop.permute.xlu1 %1007 }
 0x2c4   : > { %2146 = vpow2.f32 %v1088_v46  ;;  %v1074_v53 = vsub.f32 %v2514_v36, %v1013_v50  ;;  %v1073_v55 = vsub.f32 %v2512_v35, %v1008_v51 }
 0x2c5   : > { %2148 = vpow2.f32 %v1090_v47 }
 0x2c6   : > { %v1092_v57 = vmul.f32 1.442695, %v1073_v55  ;;  %v1094_v11 = vmul.f32 1.442695, %v1074_v53 }
 0x2c7   : > { %v1023_v58 = vpop.permute.xlu0 %1022  ;;  %v1018_v61 = vpop.permute.xlu1 %1017 }
 0x2c8   : > { %v1076_v1 = vsub.f32 %v2523_v49, %v1023_v58  ;;  %v1075_v23 = vsub.f32 %v2521_v48, %v1018_v61  ;;  %2150 = vpow2.f32 %v1092_v57 }
 0x2c9   : > { %2152 = vpow2.f32 %v1094_v11 }
 0x2ca   : > { %v1098_v22 = vmul.f32 1.442695, %v1076_v1  ;;  %v1096_v2 = vmul.f32 1.442695, %v1075_v23  ;;  %v2145_v4 = vpop.eup %2144 }
 0x2cb   : > { %v1033_v5 = vpop.permute.xlu0 %1032  ;;  %v1028_v6 = vpop.permute.xlu1 %1027 }
 0x2cc   : > { %2154 = vpow2.f32 %v1098_v22  ;;  %v1078_v36 = vsub.f32 %v2532_v63, %v1033_v5  ;;  %v1077_v35 = vsub.f32 %v2530_v62, %v1028_v6 }
 0x2cd   : > { %2156 = vpow2.f32 %v1096_v2 }
 0x2ce   : > { %v2147_v9 = vpop.eup %2146  ;;  %v1100_v10 = vmul.f32 1.442695, %v1077_v35  ;;  %v1102_v18 = vmul.f32 1.442695, %v1078_v36 }
 0x2cf   : > { %v2149_v17 = vpop.eup %2148  ;;  %1152 = vadd.xlane.f32.xlu1 %v2147_v9  ;;  %v1043_v49 = vpop.permute.xlu0 %1042  ;;  %v1327_v24 = vpack.c.bf16 %v2147_v9, %v2145_v4 }
 0x2d0   : > { %v1038_v48 = vpop.permute.xlu1 %1037  ;;  %v1080_v25 = vsub.f32 %v2541_v13, %v1043_v49  ;;  %1154 = vadd.xlane.f32.xlu0 %v2149_v17  ;;  %2158 = vpow2.f32 %v1100_v10 }
 0x2d1   : > { %v1079_v14 = vsub.f32 %v2539_v12, %v1038_v48  ;;  %2020 = vmatprep.mubr.bf16.mxu0 %v1327_v24  ;;  %2160 = vpow2.f32 %v1102_v18  ;;  %v986_v18 = vmul.f32 1.442695, %v956_v56 }
 0x2d2   : > { %v1106_v63 = vmul.f32 1.442695, %v1080_v25  ;;  %v2151_v62 = vpop.eup %2150 }
 0x2d3   : > { %v1104_v34 = vmul.f32 1.442695, %v1079_v14  ;;  %v1053_v37 = vpop.permute.xlu0 %1052  ;;  %v1328_v44 = vpack.c.bf16 %v2151_v62, %v2149_v17  ;;  %v2153_v45 = vpop.eup %2152  ;;  %v988_v17 = vmul.f32 1.442695, %v957_v3 }
 0x2d4   : > { %v1048_v40 = vpop.permute.xlu1 %1047  ;;  %2162 = vpow2.f32 %v1106_v63  ;;  %v1082_v41 = vsub.f32 %v2550_v28, %v1053_v37  ;;  %1150 = vadd.xlane.f32.xlu0 %v2145_v4 }
 0x2d5   : > { %v1081_v43 = vsub.f32 %v2548_v27, %v1048_v40  ;;  %2164 = vpow2.f32 %v1104_v34  ;;  %2021 = vmatmul.mubr.bf16.vlgmr.msra.gmra.mrb[16].mxu0 %v1328_v44  ;;  %v1119_v40 = vld [vmem:[#allocation3 + $0x8] sm:$0xff] }
 0x2d6   : > { %v2155_v13 = vpop.eup %2154  ;;  %v1110_v47 = vmul.f32 1.442695, %v1082_v41  ;;  %v1135_v44 = vmul.f32 %v2652_v59, %v1119_v40 }
 0x2d7   : > { %v1108_v46 = vmul.f32 1.442695, %v1081_v43  ;;  %v2157_v12 = vpop.eup %2156  ;;  %1162 = vadd.xlane.f32.xlu1 %v2155_v13  ;;  %v1063_v50 = vpop.permute.xlu0 %1062  ;;  %v1120_v43 = vld [vmem:[#allocation3 + $0x10] sm:$0xff] }
 0x2d8   : > { %v1058_v51 = vpop.permute.xlu1 %1057  ;;  %v1084_v53 = vsub.f32 %v2555_v38, %v1063_v50  ;;  %1156 = vadd.xlane.f32.xlu0 %v2151_v62  ;;  %v1329_v28 = vpack.c.bf16 %v2157_v12, %v2153_v45 }
 0x2d9   : > { %v1083_v55 = vsub.f32 %v2557_v39, %v1058_v51  ;;  %2166 = vpow2.f32 %v1108_v46 }
 0x2da   : > { %v1114_v57 = vmul.f32 1.442695, %v1084_v53  ;;  %2024 = vmatprep.mubr.bf16.mxu0 %v1329_v28  ;;  %v2159_v11 = vpop.eup %2158  ;;  %2168 = vpow2.f32 %v1110_v47  ;;  %v1118_v47 = vld [vmem:[#allocation3] sm:$0xff]  ;;  %v1124_v53 = vld [vmem:[#allocation3 + $0x30] sm:$0xff]  ;;  %v1121_v28 = vld [vmem:[#allocation3 + $0x18] sm:$0xff] }
 0x2db   : > { %v1112_v27 = vmul.f32 1.442695, %v1083_v55  ;;  %1158 = vadd.xlane.f32.xlu1 %v2153_v45  ;;  %v1330_v1 = vpack.c.bf16 %v2159_v11, %v2155_v13  ;;  %v2161_v23 = vpop.eup %2160  ;;  %v2740_v3 = vpop.permute.xlu0 %1238  ;;  %v1136_v45 = vmul.f32 %v2670_v15, %v1120_v43  ;;  %v1134_v51 = vmul.f32 %v2663_v7, %v1118_v47 }
 0x2dc   : > { %v1068_v58 = vpop.permute.xlu1 %1067  ;;  %2170 = vpow2.f32 %v1114_v57  ;;  %1164 = vadd.xlane.f32.xlu0 %v2159_v11  ;;  %v1137_v59 = vmul.f32 %v2678_v19, %v1121_v28  ;;  %v1122_v11 = vld [vmem:[#allocation3 + $0x20] sm:$0xff] }
 0x2dd   : > { %v1085_v61 = vsub.f32 %v2561_v60, %v1068_v58  ;;  %2172 = vpow2.f32 %v1112_v27  ;;  %2025 = vmatmul.mubr.bf16.gmra.mrb[20].mxu0 %v1330_v1  ;;  %v1140_v27 = vmul.f32 %v2672_v16, %v1124_v53  ;;  %v1125_v1 = vld [vmem:[#allocation3 + $0x38] sm:$0xff]  ;;  %v1138_v7 = vmul.f32 %v2665_v8, %v1122_v11  ;;  %v1128_v16 = vld [vmem:[#allocation3 + $0x50] sm:$0xff]  ;;  %v1126_v8 = vld [vmem:[#allocation3 + $0x40] sm:$0xff] }
 0x2de   : > { %v2163_v38 = vpop.eup %2162  ;;  %v1215_v11 = vld [vmem:[#allocation4] sm:$0xff] }
 0x2df   : > { %v1116_v22 = vmul.f32 1.442695, %v1085_v61  ;;  %v2165_v39 = vpop.eup %2164  ;;  %1170 = vadd.xlane.f32.xlu1 %v2163_v38  ;;  %v2744_v42 = vpop.permute.xlu0 %1253 }
 0x2e0   : > { %1160 = vadd.xlane.f32.xlu0 %v2157_v12  ;;  %v1331_v2 = vpack.c.bf16 %v2165_v39, %v2161_v23  ;;  %v2734_v24 = vpop.permute.xlu1 %1233 }
 0x2e1   : > { %2174 = vpow2.f32 %v1116_v22 }
 0x2e2   : > { %2028 = vmatprep.mubr.bf16.mxu0 %v1331_v2  ;;  %2176 = vpow2.f32 %v988_v17 }
 0x2e3   : > { %v2167_v5 = vpop.eup %2166  ;;  %1166 = vadd.xlane.f32.xlu1 %v2161_v23  ;;  %2178 = vpow2.f32 %v986_v18  ;;  %v2748_v56 = vpop.permute.xlu0 %1263 }
 0x2e4   : > { %1172 = vadd.xlane.f32.xlu0 %v2167_v5  ;;  %v1332_v6 = vpack.c.bf16 %v2167_v5, %v2163_v38  ;;  %v2169_v36 = vpop.eup %2168  ;;  %v2736_v54 = vpop.permute.xlu1 %1243  ;;  %v1141_v38 = vmul.f32 %v2691_v21, %v1125_v1  ;;  %v1123_v5 = vld [vmem:[#allocation3 + $0x28] sm:$0xff]  ;;  %v1311_v1 = vmul.f32 %v2734_v24, %v1215_v11 }
 0x2e6   : > { %v2171_v35 = vpop.eup %2170  ;;  %2029 = vmatmul.mubr.bf16.gmra.mrb[24].mxu0 %v1332_v6  ;;  %v1144_v6 = vmul.f32 %v2680_v20, %v1128_v16  ;;  %v1132_v20 = vld [vmem:[#allocation3 + $0x70] sm:$0xff] }
 0x2e7   : > { %v2173_v60 = vpop.eup %2172  ;;  %1178 = vadd.xlane.f32.xlu1 %v2171_v35  ;;  %v2752_v63 = vpop.permute.xlu0 %1283 }
 0x2e8   : > { %1168 = vadd.xlane.f32.xlu0 %v2165_v39  ;;  %v1333_v4 = vpack.c.bf16 %v2173_v60, %v2169_v36  ;;  %v2738_v0 = vpop.permute.xlu1 %1248 }
 0x2ea   : > { %2032 = vmatprep.mubr.bf16.mxu0 %v1333_v4 }
 0x2eb   : > { %v2175_v9 = vpop.eup %2174  ;;  %1174 = vadd.xlane.f32.xlu1 %v2169_v36  ;;  %v2756_v62 = vpop.permute.xlu0 %1273  ;;  %v1139_v36 = vmul.f32 %v2685_v26, %v1123_v5 }
 0x2ec   : > { %v1334_v10 = vpack.c.bf16 %v2175_v9, %v2171_v35  ;;  %1180 = vadd.xlane.f32.xlu0 %v2175_v9  ;;  %v2728_v49 = vpop.eup %2176  ;;  %v2742_v25 = vpop.permute.xlu1 %1258  ;;  %v1129_v9 = vld [vmem:[#allocation3 + $0x58] sm:$0xff] }
 0x2ed   : > { %v2731_v48 = vpop.eup %2178  ;;  %v1145_v17 = vmul.f32 %v2697_v31, %v1129_v9 }
 0x2ee   : > { %2033 = vmatmul.mubr.bf16.gmra.mrb[28].mxu0 %v1334_v10  ;;  %v1142_v10 = vmul.f32 %v2687_v29, %v1126_v8  ;;  %v1130_v29 = vld [vmem:[#allocation3 + $0x60] sm:$0xff] }
 0x2ef   : > { %v2760_v41 = vpop.permute.xlu0 %1293 }
 0x2f0   : > { %1176 = vadd.xlane.f32.xlu0 %v2173_v60  ;;  %v2746_v52 = vpop.permute.xlu1 %1268 }
 0x2f4   : > { %v2750_v14 = vpop.permute.xlu1 %1288 }
 0x2f8   : > { %v2754_v34 = vpop.permute.xlu1 %1278 }
 0x2fc   : > { %1308 = vperm.xlu1 %2099, %v2728_v49   ;;  %v2758_v37 = vpop.permute.xlu1 %1298 }
 0x306   : > { %1303 = vperm.xlu0 %2098, %v2731_v48  }
 0x35c   : > { %v1153_v13 = vpop.xlane.xlu1 %1152 }
 0x35d   : > { %v1155_v46 = vpop.xlane.xlu0 %1154  ;;  %v1183_v12 = vadd.f32 %v1153_v13, %v1135_v44  ;;  %v1127_v44 = vld [vmem:[#allocation3 + $0x48] sm:$0xff] }
 0x35e   : > { %v1184_v50 = vadd.f32 %v1155_v46, %v1136_v45  ;;  %v1148_v45 = vmul.f32 %v2731_v48, %v1132_v20  ;;  %v1143_v13 = vmul.f32 %v2700_v32, %v1127_v44  ;;  %v1225_v20 = vld [vmem:[#allocation4 + $0x50] sm:$0xff]  ;;  %v1224_v44 = vld [vmem:[#allocation4 + $0x48] sm:$0xff] }
 0x35f   : > { %1200 = vst.msk [vmem:[#allocation3 + $0x8] sm:$0xff] %vm1198_vm2, %v1183_v12 }
 0x360   : > { %1201 = vst.msk [vmem:[#allocation3 + $0x10] sm:$0xff] %vm1198_vm2, %v1184_v50  ;;  %v1133_v50 = vld [vmem:[#allocation3 + $0x78] sm:$0xff] }
 0x361   : > { %v1151_v55 = vpop.xlane.xlu0 %1150  ;;  %v1149_v53 = vmul.f32 %v2728_v49, %v1133_v50 }
 0x362   : > { %v1182_v57 = vadd.f32 %v1151_v55, %v1134_v51  ;;  %v1146_v51 = vmul.f32 %v2693_v30, %v1130_v29  ;;  %v1217_v30 = vld [vmem:[#allocation4 + $0x10] sm:$0xff] }
 0x363   : > { %v1313_v49 = vmul.f32 %v2736_v54, %v1217_v30  ;;  %v1222_v54 = vld [vmem:[#allocation4 + $0x38] sm:$0xff] }
 0x364   : > { %1199 = vst.msk [vmem:[#allocation3] sm:$0xff] %vm1198_vm2, %v1182_v57  ;;  %v1163_v15 = vpop.xlane.xlu1 %1162  ;;  %v1131_v57 = vld [vmem:[#allocation3 + $0x68] sm:$0xff] }
 0x365   : > { %v1157_v58 = vpop.xlane.xlu0 %1156  ;;  %v1188_v61 = vadd.f32 %v1163_v15, %v1140_v27  ;;  %v1147_v32 = vmul.f32 %v2703_v33, %v1131_v57 }
 0x366   : > { %v1185_v23 = vadd.f32 %v1157_v58, %v1137_v59  ;;  %v1218_v58 = vld [vmem:[#allocation4 + $0x18] sm:$0xff] }
 0x367   : > { %1205 = vst.msk [vmem:[#allocation3 + $0x30] sm:$0xff] %vm1198_vm2, %v1188_v61  ;;  %v1216_v61 = vld [vmem:[#allocation4 + $0x8] sm:$0xff] }
 0x368   : > { %1202 = vst.msk [vmem:[#allocation3 + $0x18] sm:$0xff] %vm1198_vm2, %v1185_v23  ;;  %v1159_v22 = vpop.xlane.xlu1 %1158  ;;  %v1312_v16 = vmul.f32 %v2740_v3, %v1216_v61  ;;  %v1318_v3 = vmul.f32 %v2746_v52, %v1222_v54 }
 0x369   : > { %v1165_v39 = vpop.xlane.xlu0 %1164  ;;  %v1186_v2 = vadd.f32 %v1159_v22, %v1138_v7  ;;  %v1314_v7 = vmul.f32 %v2738_v0, %v1218_v58 }
 0x36a   : > { %v1189_v19 = vadd.f32 %v1165_v39, %v1141_v38 }
 0x36b   : > { %1203 = vst.msk [vmem:[#allocation3 + $0x20] sm:$0xff] %vm1198_vm2, %v1186_v2 }
 0x36c   : > { %1206 = vst.msk [vmem:[#allocation3 + $0x38] sm:$0xff] %vm1198_vm2, %v1189_v19  ;;  %v1171_v35 = vpop.xlane.xlu1 %1170  ;;  %v1221_v19 = vld [vmem:[#allocation4 + $0x30] sm:$0xff] }
 0x36d   : > { %v1161_v60 = vpop.xlane.xlu0 %1160  ;;  %v1192_v4 = vadd.f32 %v1171_v35, %v1144_v6  ;;  %v1317_v24 = vmul.f32 %v2748_v56, %v1221_v19  ;;  %v1220_v35 = vld [vmem:[#allocation4 + $0x28] sm:$0xff]  ;;  %v1226_v56 = vld [vmem:[#allocation4 + $0x58] sm:$0xff] }
 0x36e   : > { %v1187_v21 = vadd.f32 %v1161_v60, %v1139_v36  ;;  %v1219_v36 = vld [vmem:[#allocation4 + $0x20] sm:$0xff]  ;;  %v1316_v9 = vmul.f32 %v2742_v25, %v1220_v35  ;;  %v1322_v25 = vmul.f32 %v2750_v14, %v1226_v56 }
 0x36f   : > { %1209 = vst.msk [vmem:[#allocation3 + $0x50] sm:$0xff] %vm1198_vm2, %v1192_v4  ;;  %v1315_v0 = vmul.f32 %v2744_v42, %v1219_v36  ;;  %v1321_v42 = vmul.f32 %v2752_v63, %v1225_v20  ;;  %v1227_v63 = vld [vmem:[#allocation4 + $0x60] sm:$0xff] }
 0x370   : > { %1204 = vst.msk [vmem:[#allocation3 + $0x28] sm:$0xff] %vm1198_vm2, %v1187_v21  ;;  %v1167_v18 = vpop.xlane.xlu1 %1166 }
 0x371   : > { %v1173_v40 = vpop.xlane.xlu0 %1172  ;;  %v1190_v43 = vadd.f32 %v1167_v18, %v1142_v10 }
 0x372   : > { %v1193_v26 = vadd.f32 %v1173_v40, %v1145_v17 }
 0x373   : > { %1207 = vst.msk [vmem:[#allocation3 + $0x40] sm:$0xff] %vm1198_vm2, %v1190_v43  ;;  %v1223_v43 = vld [vmem:[#allocation4 + $0x40] sm:$0xff] }
 0x374   : > { %1210 = vst.msk [vmem:[#allocation3 + $0x58] sm:$0xff] %vm1198_vm2, %v1193_v26  ;;  %v1179_v46 = vpop.xlane.xlu1 %1178  ;;  %v1319_v52 = vmul.f32 %v2756_v62, %v1223_v43 }
 0x375   : > { %v1169_v12 = vpop.xlane.xlu0 %1168  ;;  %v1196_v47 = vadd.f32 %v1179_v46, %v1148_v45  ;;  %v1320_v46 = vmul.f32 %v2754_v34, %v1224_v44 }
 0x376   : > { %v1191_v31 = vadd.f32 %v1169_v12, %v1143_v13 }
 0x377   : > { %1213 = vst.msk [vmem:[#allocation3 + $0x70] sm:$0xff] %vm1198_vm2, %v1196_v47 }
 0x378   : > { %1208 = vst.msk [vmem:[#allocation3 + $0x48] sm:$0xff] %vm1198_vm2, %v1191_v31  ;;  %v1175_v55 = vpop.xlane.xlu1 %1174  ;;  %v1229_v31 = vld [vmem:[#allocation4 + $0x70] sm:$0xff] }
 0x379   : > { %v1181_v48 = vpop.xlane.xlu0 %1180  ;;  %v1194_v28 = vadd.f32 %v1175_v55, %v1146_v51  ;;  %v1230_v55 = vld [vmem:[#allocation4 + $0x78] sm:$0xff] }
 0x37a   : > { %v1197_v27 = vadd.f32 %v1181_v48, %v1149_v53  ;;  %v1228_v48 = vld [vmem:[#allocation4 + $0x68] sm:$0xff]  ;;  %v1508_v19 = vld [vmem:[#allocation3 + $0x40] sm:$0xff] (!%p1873_p13) }
 0x37b   : > { %1211 = vst.msk [vmem:[#allocation3 + $0x60] sm:$0xff] %vm1198_vm2, %v1194_v28  ;;  %v1323_v28 = vmul.f32 %v2760_v41, %v1227_v63  ;;  %v1500_v41 = vld [vmem:[#allocation3] sm:$0xff] (!%p1873_p13)  ;;  %v1511_v36 = vld [vmem:[#allocation3 + $0x58] sm:$0xff] (!%p1873_p13) }
 0x37c   : > { %1214 = vst.msk [vmem:[#allocation3 + $0x78] sm:$0xff] %vm1198_vm2, %v1197_v27  ;;  %v1309_v62 = vpop.permute.xlu1 %1308 }
 0x37d   : > { %v1177_v59 = vpop.xlane.xlu0 %1176  ;;  %v1326_v34 = vmul.f32 %v1309_v62, %v1230_v55 }
 0x37e   : > { %v1195_v15 = vadd.f32 %v1177_v59, %v1147_v32  ;;  %v1324_v59 = vmul.f32 %v2758_v37, %v1228_v48  ;;  %v1501_v37 = vld [vmem:[#allocation3 + $0x8] sm:$0xff] (!%p1873_p13) }
 0x380   : > { %1212 = vst.msk [vmem:[#allocation3 + $0x68] sm:$0xff] %vm1198_vm2, %v1195_v15 }
 0x385   : > { %v1304_v51 = vpop.permute.xlu0 %1303 }
 0x386   : > { %v1325_v14 = vmul.f32 %v1304_v51, %v1229_v31 }
 0x3a8   : > { %v2022_v23 = vpop.f32.mrb[16].mxu0 }
 0x3a9   : > { %v1434_v38 = vadd.f32 %v2022_v23, %v1313_v49  ;;  %v1369_v22 = vpop.f32.mrb[17].mxu0  ;;  %v1502_v49 = vld [vmem:[#allocation3 + $0x10] sm:$0xff] (!%p1873_p13)  ;;  %v2307_v23 = vmov (!%p1873_p13), 0  }
 0x3aa   : > { %v1432_v33 = vadd.f32 %v1369_v22, %v1311_v1  ;;  %v2023_v39 = vpop.f32.mrb[18].mxu0  ;;  %v1503_v1 = vld [vmem:[#allocation3 + $0x18] sm:$0xff] (!%p1873_p13)  ;;  %2181 = vset.pattern.permute.xlu1 (!%p1873_p13), %v2307_v23  ;;  %2180 = vset.pattern.permute.xlu0 (!%p1873_p13), %v2307_v23  ;;  %2182 = vrcp.f32 (!%p1873_p13), %v1502_v49 }
 0x3ab   : > { %1450 = vst [vmem:[#allocation4 + $0x10] sm:$0xff] %v1434_v38  ;;  %v1435_v2 = vadd.f32 %v2023_v39, %v1314_v7  ;;  %v1372_v5 = vpop.f32.mrb[19].mxu0  ;;  %2184 = vrcp.f32 (!%p1873_p13), %v1500_v41  ;;  %v1505_v7 = vld [vmem:[#allocation3 + $0x28] sm:$0xff] (!%p1873_p13)  ;;  %v1504_v38 = vld [vmem:[#allocation3 + $0x20] sm:$0xff] (!%p1873_p13)  ;;  %v1507_v22 = vld [vmem:[#allocation3 + $0x38] sm:$0xff] (!%p1873_p13) }
 0x3ac   : > { %1448 = vst [vmem:[#allocation4] sm:$0xff] %v1432_v33  ;;  %v1433_v6 = vadd.f32 %v1372_v5, %v1312_v16  ;;  %2186 = vrcp.f32 (!%p1873_p13), %v1503_v1  ;;  %v1506_v16 = vld [vmem:[#allocation3 + $0x30] sm:$0xff] (!%p1873_p13) }
 0x3ad   : > { %1451 = vst [vmem:[#allocation4 + $0x18] sm:$0xff] %v1435_v2  ;;  %2188 = vrcp.f32 (!%p1873_p13), %v1501_v37  ;;  %v1509_v2 = vld [vmem:[#allocation3 + $0x48] sm:$0xff] (!%p1873_p13) }
 0x3ae   : > { %1449 = vst [vmem:[#allocation4 + $0x8] sm:$0xff] %v1433_v6  ;;  %2190 = vrcp.f32 (!%p1873_p13), %v1505_v7 }
 0x3af   : > { %2192 = vrcp.f32 (!%p1873_p13), %v1504_v38 }
 0x3b0   : > { %v2026_v8 = vpop.f32.mrb[20].mxu0  ;;  %2194 = vrcp.f32 (!%p1873_p13), %v1507_v22 }
 0x3b1   : > { %v1438_v60 = vadd.f32 %v2026_v8, %v1317_v24  ;;  %v1385_v4 = vpop.f32.mrb[21].mxu0  ;;  %2196 = vrcp.f32 (!%p1873_p13), %v1506_v16  ;;  %v1510_v24 = vld [vmem:[#allocation3 + $0x50] sm:$0xff] (!%p1873_p13) }
 0x3b2   : > { %v1436_v21 = vadd.f32 %v1385_v4, %v1315_v0  ;;  %v2027_v10 = vpop.f32.mrb[22].mxu0  ;;  %2198 = vrcp.f32 (!%p1873_p13), %v1509_v2  ;;  %v1513_v0 = vld [vmem:[#allocation3 + $0x68] sm:$0xff] (!%p1873_p13)  ;;  %v1515_v4 = vld [vmem:[#allocation3 + $0x78] sm:$0xff] (!%p1873_p13) }
 0x3b3   : > { %1454 = vst [vmem:[#allocation4 + $0x30] sm:$0xff] %v1438_v60  ;;  %v1439_v17 = vadd.f32 %v2027_v10, %v1318_v3  ;;  %v1388_v18 = vpop.f32.mrb[23].mxu0  ;;  %2200 = vrcp.f32 (!%p1873_p13), %v1508_v19  ;;  %v1512_v3 = vld [vmem:[#allocation3 + $0x60] sm:$0xff] (!%p1873_p13) }
 0x3b4   : > { %1452 = vst [vmem:[#allocation4 + $0x20] sm:$0xff] %v1436_v21  ;;  %v1437_v40 = vadd.f32 %v1388_v18, %v1316_v9  ;;  %v2183_v33 = vpop.eup (!%p1873_p13), %2182  ;;  %2202 = vrcp.f32 (!%p1873_p13), %v1511_v36  ;;  %v1514_v21 = vld [vmem:[#allocation3 + $0x70] sm:$0xff] (!%p1873_p13)  ;;  %v1484_v44 = vld [vmem:[#allocation4] sm:$0xff] (!%p1873_p13) }
 0x3b5   : > { %1455 = vst [vmem:[#allocation4 + $0x38] sm:$0xff] %v1439_v17  ;;  %v2185_v39 = vpop.eup (!%p1873_p13), %2184  ;;  %1544 = vperm.xlu1 (!%p1873_p13), %2181, %v2183_v33   ;;  %2204 = vrcp.f32 (!%p1873_p13), %v1510_v24 }
 0x3b6   : > { %1453 = vst [vmem:[#allocation4 + $0x28] sm:$0xff] %v1437_v40  ;;  %v2187_v5 = vpop.eup (!%p1873_p13), %2186  ;;  %1534 = vperm.xlu0 (!%p1873_p13), %2180, %v2185_v39   ;;  %2206 = vrcp.f32 (!%p1873_p13), %v1513_v0 }
 0x3b7   : > { %v2189_v6 = vpop.eup (!%p1873_p13), %2188  ;;  %2208 = vrcp.f32 (!%p1873_p13), %v1512_v3 }
 0x3b8   : > { %v2191_v54 = vpop.eup (!%p1873_p13), %2190  ;;  %2210 = vrcp.f32 (!%p1873_p13), %v1515_v4 }
 0x3b9   : > { %v2030_v26 = vpop.f32.mrb[24].mxu0  ;;  %1549 = vperm.xlu1 (!%p1873_p13), %2181, %v2187_v5   ;;  %v2193_v35 = vpop.eup (!%p1873_p13), %2192  ;;  %2212 = vrcp.f32 (!%p1873_p13), %v1514_v21 }
 0x3ba   : > { %v1442_v45 = vadd.f32 %v2030_v26, %v1321_v42  ;;  %v1401_v13 = vpop.f32.mrb[25].mxu0  ;;  %1539 = vperm.xlu0 (!%p1873_p13), %2180, %v2189_v6   ;;  %v2195_v8 = vpop.eup (!%p1873_p13), %2194  ;;  %v1486_v42 = vld [vmem:[#allocation4 + $0x10] sm:$0xff] (!%p1873_p13) }
 0x3bb   : > { %v1440_v29 = vadd.f32 %v1401_v13, %v1319_v52  ;;  %v2031_v12 = vpop.f32.mrb[26].mxu0  ;;  %v2197_v60 = vpop.eup (!%p1873_p13), %2196  ;;  %v1487_v13 = vld [vmem:[#allocation4 + $0x18] sm:$0xff] (!%p1873_p13)  ;;  %v1488_v48 = vld [vmem:[#allocation4 + $0x20] sm:$0xff] (!%p1873_p13) }
 0x3bc   : > { %1458 = vst [vmem:[#allocation4 + $0x50] sm:$0xff] %v1442_v45  ;;  %v1443_v47 = vadd.f32 %v2031_v12, %v1322_v25  ;;  %v1404_v50 = vpop.f32.mrb[27].mxu0  ;;  %v2199_v9 = vpop.eup (!%p1873_p13), %2198 }
 0x3bd   : > { %1456 = vst [vmem:[#allocation4 + $0x40] sm:$0xff] %v1440_v29  ;;  %v1441_v53 = vadd.f32 %v1404_v50, %v1320_v46  ;;  %1559 = vperm.xlu1 (!%p1873_p13), %2181, %v2191_v54   ;;  %v2201_v10 = vpop.eup (!%p1873_p13), %2200  ;;  %v1485_v29 = vld [vmem:[#allocation4 + $0x8] sm:$0xff] (!%p1873_p13) }
 0x3be   : > { %1459 = vst [vmem:[#allocation4 + $0x58] sm:$0xff] %v1443_v47  ;;  %1554 = vperm.xlu0 (!%p1873_p13), %2180, %v2193_v35   ;;  %v2203_v17 = vpop.eup (!%p1873_p13), %2202  ;;  %v1489_v55 = vld [vmem:[#allocation4 + $0x28] sm:$0xff] (!%p1873_p13) }
 0x3bf   : > { %1457 = vst [vmem:[#allocation4 + $0x48] sm:$0xff] %v1441_v53  ;;  %v2205_v18 = vpop.eup (!%p1873_p13), %2204 }
 0x3c0   : > { %v2207_v20 = vpop.eup (!%p1873_p13), %2206 }
 0x3c1   : > { %v2034_v57 = vpop.f32.mrb[28].mxu0  ;;  %1483 = sbr.rel (%p1873_p13) target bundleno = 1127 (0x467), region = 85  ;;  %1569 = vperm.xlu1 (!%p1873_p13), %2181, %v2195_v8   ;;  %v2209_v40 = vpop.eup (!%p1873_p13), %2208 }
 0x3c2   : > { %v1446_v27 = vadd.f32 %v2034_v57, %v1325_v14  ;;  %v1417_v32 = vpop.f32.mrb[29].mxu0  ;;  %1564 = vperm.xlu0 (!%p1873_p13), %2180, %v2197_v60   ;;  %v2211_v43 = vpop.eup (!%p1873_p13), %2210 }
 0x3c3   : > { %v1444_v15 = vadd.f32 %v1417_v32, %v1323_v28  ;;  %v2035_v30 = vpop.f32.mrb[30].mxu0  ;;  %v2213_v56 = vpop.eup (!%p1873_p13), %2212  ;;  %v1494_v3 = vld [vmem:[#allocation4 + $0x50] sm:$0xff] (!%p1873_p13) }
 0x3c4   : > { %1462 = vst [vmem:[#allocation4 + $0x70] sm:$0xff] %v1446_v27  ;;  %v1447_v11 = vadd.f32 %v2035_v30, %v1326_v34  ;;  %v1420_v58 = vpop.f32.mrb[31].mxu0  ;;  %v1492_v22 = vld [vmem:[#allocation4 + $0x40] sm:$0xff] (!%p1873_p13) }
 0x3c5   : > { %1460 = vst [vmem:[#allocation4 + $0x60] sm:$0xff] %v1444_v15  ;;  %v1445_v61 = vadd.f32 %v1420_v58, %v1324_v59  ;;  %1579 = vperm.xlu1 (!%p1873_p13), %2181, %v2199_v9   ;;  %v1491_v15 = vld [vmem:[#allocation4 + $0x38] sm:$0xff] (!%p1873_p13) }
 0x3c6   : > { %1463 = vst [vmem:[#allocation4 + $0x78] sm:$0xff] %v1447_v11  ;;  %1574 = vperm.xlu0 (!%p1873_p13), %2180, %v2201_v10   ;;  %v1490_v11 = vld [vmem:[#allocation4 + $0x30] sm:$0xff] (!%p1873_p13)  ;;  %v1493_v7 = vld [vmem:[#allocation4 + $0x48] sm:$0xff] (!%p1873_p13)  ;;  %v1495_v35 = vld [vmem:[#allocation4 + $0x58] sm:$0xff] (!%p1873_p13) }
 0x3c7   : > { %1461 = vst [vmem:[#allocation4 + $0x68] sm:$0xff] %v1445_v61 }
 0x3c9   : > { %1589 = vperm.xlu1 %2181, %v2203_v17  }
 0x3ca   : > { %1584 = vperm.xlu0 %2180, %v2205_v18  }
 0x3cd   : > { %1599 = vperm.xlu1 %2181, %v2207_v20  }
 0x3ce   : > { %1594 = vperm.xlu0 %2180, %v2209_v40  }
 0x3d1   : > { %1609 = vperm.xlu1 %2181, %v2211_v43  }
 0x3d2   : > { %1604 = vperm.xlu0 %2180, %v2213_v56  }
 0x434   : > { %v1545_v52 = vpop.permute.xlu1 %1544 }
 0x435   : > { %v1614_v26 = vmul.f32 %v1545_v52, %v1486_v42  ;;  %v1535_v25 = vpop.permute.xlu0 %1534 }
 0x436   : > { %v2809_v45 = vmul.f32 %v1535_v25, %v1484_v44  ;;  %v1497_v44 = vld [vmem:[#allocation4 + $0x68] sm:$0xff]  ;;  %v1496_v25 = vld [vmem:[#allocation4 + $0x60] sm:$0xff] }
 0x437   : > { %v1646_v46 = vmin.f32 %v1614_v26, 0.0  ;;  %vm1630_vm3 = vcmp.gt.f32.partialorder %v1614_v26, 0.0 }
 0x438   : > { %v1644_v12 = vmin.f32 %v2809_v45, 0.0  ;;  %v1550_v47 = vpop.permute.xlu1 %1549  ;;  %vm1628_vm4 = vcmp.gt.f32.partialorder %v2809_v45, 0.0 }
 0x439   : > { %v1664_v50 = vmul.f32 1.442695, %v1646_v46  ;;  %v2812_v31 = vmul.f32 %v1550_v47, %v1487_v13  ;;  %v1540_v51 = vpop.permute.xlu0 %1539 }
 0x43a   : > { %v1660_v53 = vmul.f32 1.442695, %v1644_v12  ;;  %v2814_v63 = vmul.f32 %v1540_v51, %v1485_v29 }
 0x43b   : > { %2214 = vpow2.f32 %v1664_v50  ;;  %v1647_v62 = vmin.f32 %v2812_v31, 0.0  ;;  %vm1631_vm5 = vcmp.gt.f32.partialorder %v2812_v31, 0.0 }
 0x43c   : > { %2216 = vpow2.f32 %v1660_v53  ;;  %v1645_v14 = vmin.f32 %v2814_v63, 0.0  ;;  %v1560_v28 = vpop.permute.xlu1 %1559  ;;  %vm1629_vm6 = vcmp.gt.f32.partialorder %v2814_v63, 0.0 }
 0x43d   : > { %v1666_v57 = vmul.f32 1.442695, %v1647_v62  ;;  %v2818_v34 = vmul.f32 %v1560_v28, %v1489_v55  ;;  %v1555_v27 = vpop.permute.xlu0 %1554 }
 0x43e   : > { %v1662_v32 = vmul.f32 1.442695, %v1645_v14  ;;  %v2820_v59 = vmul.f32 %v1555_v27, %v1488_v48  ;;  %v1499_v48 = vld [vmem:[#allocation4 + $0x78] sm:$0xff] }
 0x43f   : > { %2218 = vpow2.f32 %v1666_v57  ;;  %v1649_v30 = vmin.f32 %v2818_v34, 0.0  ;;  %vm1633_vm7 = vcmp.gt.f32.partialorder %v2818_v34, 0.0 }
 0x440   : > { %2220 = vpow2.f32 %v1662_v32  ;;  %v1648_v58 = vmin.f32 %v2820_v59, 0.0  ;;  %v1570_v61 = vpop.permute.xlu1 %1569  ;;  %vm1632_vm8 = vcmp.gt.f32.partialorder %v2820_v59, 0.0 }
 0x441   : > { %v1670_v49 = vmul.f32 1.442695, %v1649_v30  ;;  %v2824_v41 = vmul.f32 %v1570_v61, %v1491_v15  ;;  %v1565_v1 = vpop.permute.xlu0 %1564 }
 0x442   : > { %v1668_v23 = vmul.f32 1.442695, %v1648_v58  ;;  %v2826_v37 = vmul.f32 %v1565_v1, %v1490_v11 }
 0x443   : > { %2222 = vpow2.f32 %v1670_v49  ;;  %v1651_v38 = vmin.f32 %v2824_v41, 0.0  ;;  %vm1635_vm9 = vcmp.gt.f32.partialorder %v2824_v41, 0.0 }
 0x444   : > { %2224 = vpow2.f32 %v1668_v23  ;;  %v1650_v16 = vmin.f32 %v2826_v37, 0.0  ;;  %v1580_v33 = vpop.permute.xlu1 %1579  ;;  %vm1634_vm10 = vcmp.gt.f32.partialorder %v2826_v37, 0.0 }
 0x445   : > { %v2215_v39 = vpop.eup %2214  ;;  %v1674_v2 = vmul.f32 1.442695, %v1651_v38  ;;  %v2830_v5 = vmul.f32 %v1580_v33, %v1493_v7  ;;  %v1575_v19 = vpop.permute.xlu0 %1574 }
 0x446   : > { %v2217_v6 = vpop.eup %2216  ;;  %v1876_v36 = vadd.f32 -1.0, %v2215_v39  ;;  %v1672_v54 = vmul.f32 1.442695, %v1650_v16  ;;  %v2832_v24 = vmul.f32 %v1575_v19, %v1492_v22 }
 0x447   : > { %v1874_v0 = vadd.f32 -1.0, %v2217_v6  ;;  %2226 = vpow2.f32 %v1674_v2  ;;  %v1653_v8 = vmin.f32 %v2830_v5, 0.0  ;;  %vm1637_vm11 = vcmp.gt.f32.partialorder %v2830_v5, 0.0 }
 0x448   : > { %v1710_v60 = vsel %vm1630_vm3, %v1614_v26, %v1876_v36  ;;  %2228 = vpow2.f32 %v1672_v54  ;;  %v1652_v4 = vmin.f32 %v2832_v24, 0.0  ;;  %v1590_v9 = vpop.permute.xlu1 %1589  ;;  %vm1636_vm12 = vcmp.gt.f32.partialorder %v2832_v24, 0.0 }
 0x449   : > { %v2219_v21 = vpop.eup %2218  ;;  %1726 = vst [vmem:[%s2424_s7 + $0x10] sm:$0xff] %v1710_v60  ;;  %v1708_v10 = vsel %vm1628_vm4, %v2809_v45, %v1874_v0  ;;  %v1678_v17 = vmul.f32 1.442695, %v1653_v8  ;;  %v2839_v18 = vmul.f32 %v1590_v9, %v1495_v35  ;;  %v1585_v20 = vpop.permute.xlu0 %1584 }
 0x44a   : > { %v2221_v40 = vpop.eup %2220  ;;  %1724 = vst [vmem:[%s2424_s7] sm:$0xff] %v1708_v10  ;;  %v1877_v43 = vadd.f32 -1.0, %v2219_v21  ;;  %v1676_v56 = vmul.f32 1.442695, %v1652_v4  ;;  %v2842_v42 = vmul.f32 %v1585_v20, %v1494_v3 }
 0x44b   : > { %v1875_v52 = vadd.f32 -1.0, %v2221_v40  ;;  %2230 = vpow2.f32 %v1678_v17  ;;  %v1655_v26 = vmin.f32 %v2839_v18, 0.0  ;;  %vm1639_vm13 = vcmp.gt.f32.partialorder %v2839_v18, 0.0 }
 0x44c   : > { %v1711_v45 = vsel %vm1631_vm5, %v2812_v31, %v1877_v43  ;;  %2232 = vpow2.f32 %v1676_v56  ;;  %v1654_v13 = vmin.f32 %v2842_v42, 0.0  ;;  %v1600_v46 = vpop.permute.xlu1 %1599  ;;  %vm1638_vm14 = vcmp.gt.f32.partialorder %v2842_v42, 0.0 }
 0x44d   : > { %v2223_v29 = vpop.eup %2222  ;;  %1727 = vst [vmem:[%s2424_s7 + $0x18] sm:$0xff] %v1711_v45  ;;  %v1709_v12 = vsel %vm1629_vm6, %v2814_v63, %v1875_v52  ;;  %v1682_v47 = vmul.f32 1.442695, %v1655_v26  ;;  %v2851_v50 = vmul.f32 %v1600_v46, %v1497_v44  ;;  %v1595_v51 = vpop.permute.xlu0 %1594  ;;  %v1498_v63 = vld [vmem:[#allocation4 + $0x70] sm:$0xff] }
 0x44e   : > { %v2225_v53 = vpop.eup %2224  ;;  %1725 = vst [vmem:[%s2424_s7 + $0x8] sm:$0xff] %v1709_v12  ;;  %v1879_v55 = vadd.f32 -1.0, %v2223_v29  ;;  %v1680_v62 = vmul.f32 1.442695, %v1654_v13  ;;  %v2854_v31 = vmul.f32 %v1595_v51, %v1496_v25 }
 0x44f   : > { %v1878_v14 = vadd.f32 -1.0, %v2225_v53  ;;  %2234 = vpow2.f32 %v1682_v47  ;;  %v1657_v28 = vmin.f32 %v2851_v50, 0.0  ;;  %vm1641_vm15 = vcmp.gt.f32.partialorder %v2851_v50, 0.0 }
 0x450   : > { %v1713_v57 = vsel %vm1633_vm7, %v2818_v34, %v1879_v55  ;;  %2236 = vpow2.f32 %v1680_v62  ;;  %v1656_v27 = vmin.f32 %v2854_v31, 0.0  ;;  %v1610_v32 = vpop.permute.xlu1 %1609  ;;  %vm1640_vm0 = vcmp.gt.f32.partialorder %v2854_v31, 0.0 }
 0x451   : > { %v2227_v15 = vpop.eup %2226  ;;  %1729 = vst [vmem:[%s2424_s7 + $0x28] sm:$0xff] %v1713_v57  ;;  %v1712_v30 = vsel %vm1632_vm8, %v2820_v59, %v1878_v14  ;;  %v1686_v11 = vmul.f32 1.442695, %v1657_v28  ;;  %v1627_v58 = vmul.f32 %v1610_v32, %v1499_v48  ;;  %v1605_v61 = vpop.permute.xlu0 %1604 }
 0x452   : > { %v2229_v49 = vpop.eup %2228  ;;  %1728 = vst [vmem:[%s2424_s7 + $0x20] sm:$0xff] %v1712_v30  ;;  %v1881_v1 = vadd.f32 -1.0, %v2227_v15  ;;  %v1684_v23 = vmul.f32 1.442695, %v1656_v27  ;;  %v1626_v34 = vmul.f32 %v1605_v61, %v1498_v63 }
 0x453   : > { %v1880_v7 = vadd.f32 -1.0, %v2229_v49  ;;  %2238 = vpow2.f32 %v1686_v11  ;;  %v1659_v38 = vmin.f32 %v1627_v58, 0.0  ;;  %vm1643_vm1 = vcmp.gt.f32.partialorder %v1627_v58, 0.0 }
 0x454   : > { %v1715_v22 = vsel %vm1635_vm9, %v2824_v41, %v1881_v1  ;;  %2240 = vpow2.f32 %v1684_v23  ;;  %v1658_v59 = vmin.f32 %v1626_v34, 0.0  ;;  %vm1642_vm2 = vcmp.gt.f32.partialorder %v1626_v34, 0.0 }
 0x455   : > { %v2231_v16 = vpop.eup %2230  ;;  %1731 = vst [vmem:[%s2424_s7 + $0x38] sm:$0xff] %v1715_v22  ;;  %v1714_v33 = vsel %vm1634_vm10, %v2826_v37, %v1880_v7  ;;  %v1690_v39 = vmul.f32 1.442695, %v1659_v38 }
 0x456   : > { %v2233_v2 = vpop.eup %2232  ;;  %1730 = vst [vmem:[%s2424_s7 + $0x30] sm:$0xff] %v1714_v33  ;;  %v1883_v19 = vadd.f32 -1.0, %v2231_v16  ;;  %v1688_v6 = vmul.f32 1.442695, %v1658_v59 }
 0x457   : > { %v1882_v36 = vadd.f32 -1.0, %v2233_v2  ;;  %2242 = vpow2.f32 %v1690_v39 }
 0x458   : > { %v1717_v41 = vsel %vm1637_vm11, %v2830_v5, %v1883_v19  ;;  %2244 = vpow2.f32 %v1688_v6 }
 0x459   : > { %v2235_v54 = vpop.eup %2234  ;;  %1733 = vst [vmem:[%s2424_s7 + $0x48] sm:$0xff] %v1717_v41  ;;  %v1716_v37 = vsel %vm1636_vm12, %v2832_v24, %v1882_v36 }
 0x45a   : > { %v2237_v35 = vpop.eup %2236  ;;  %1732 = vst [vmem:[%s2424_s7 + $0x40] sm:$0xff] %v1716_v37  ;;  %v1885_v0 = vadd.f32 -1.0, %v2235_v54 }
 0x45b   : > { %v1884_v8 = vadd.f32 -1.0, %v2237_v35 }
 0x45c   : > { %v1719_v3 = vsel %vm1639_vm13, %v2839_v18, %v1885_v0 }
 0x45d   : > { %v2239_v5 = vpop.eup %2238  ;;  %1735 = vst [vmem:[%s2424_s7 + $0x58] sm:$0xff] %v1719_v3  ;;  %v1718_v60 = vsel %vm1638_vm14, %v2842_v42, %v1884_v8 }
 0x45e   : > { %v2241_v4 = vpop.eup %2240  ;;  %1734 = vst [vmem:[%s2424_s7 + $0x50] sm:$0xff] %v1718_v60  ;;  %v1887_v24 = vadd.f32 -1.0, %v2239_v5 }
 0x45f   : > { %v1886_v9 = vadd.f32 -1.0, %v2241_v4 }
 0x460   : > { %v1721_v21 = vsel %vm1641_vm15, %v2851_v50, %v1887_v24 }
 0x461   : > { %v2243_v10 = vpop.eup %2242  ;;  %1737 = vst [vmem:[%s2424_s7 + $0x68] sm:$0xff] %v1721_v21  ;;  %v1720_v17 = vsel %vm1640_vm0, %v2854_v31, %v1886_v9 }
 0x462   : > { %v2245_v18 = vpop.eup %2244  ;;  %1736 = vst [vmem:[%s2424_s7 + $0x60] sm:$0xff] %v1720_v17  ;;  %v1889_v20 = vadd.f32 -1.0, %v2243_v10 }
 0x463   : > { %v1888_v40 = vadd.f32 -1.0, %v2245_v18 }
 0x464   : > { %v1723_v43 = vsel %vm1643_vm1, %v1627_v58, %v1889_v20 }
 0x465   : > { %1739 = vst [vmem:[%s2424_s7 + $0x78] sm:$0xff] %v1723_v43  ;;  %v1722_v56 = vsel %vm1642_vm2, %v1626_v34, %v1888_v40 }
 0x466   : > { %1738 = vst [vmem:[%s2424_s7 + $0x70] sm:$0xff] %v1722_v56 }
 0x467 PF: > { %s14_s21 = sadd.s32 1, %s2300_s21   ;;  %s2916_s15 = smov %s2280_s16 }
 0x468   : > { %p11_p0 = scmp.ge.s32.totalorder %s14_s21, 6   ;;  %s2917_s16 = smov %s2384_s28 }
 0x469   : > { %s2918_s17 = smov %s2292_s19  ;;  %s2919_s18 = smov %s2296_s20 }
 0x46a   : > { %s2920_s19 = smov %s2923_s22  ;;  %s2921_s20 = smov %s2927_s23 }
 0x46b   :  { %13 = sbr.rel (!%p11_p0) target bundleno = 4 (0x4), region = 126 }

</bundles_post_ra>
